<compile_context>
chip_gen: v5e
topology: v5e:2x2
jax: 0.10.0
libtpu: 0.0.40
codegen_flags: <defaults>
</compile_context>

<pallas_src>
import jax
import jax.numpy as jnp
from jax import lax
from jax.experimental import pallas as pl
from jax.experimental.pallas import tpu as pltpu

HIDDEN = 256


# ----------------------------------------------------------------------------
# Pallas kernel: all heads in one invocation, block-diagonal head packing.
#   feat = relu(conv_slab @ Wfc_bd + bfc)              (vision_Net final FCs)
#   x    = relu(inner @ W1s_pk + feat @ W1f_bd + b1)   (parallel_Linear l1)
#   x    = relu(x @ W2_bd + b2)                        (parallel_Linear l2)
#   Q    = x @ Wq_bd + bq                              (folded dueling lV/lA)
# Weights bf16 (MXU-native), accumulation + bias/relu in f32, single store.
# ----------------------------------------------------------------------------
def _dueling_kernel(inner_ref, convf_ref, wfc_ref, bfc_ref,
                    w1s_ref, w1f_ref, b1_ref, w2_ref, b2_ref,
                    wq_ref, bq_ref, q_ref):
    # vision_Net final FC for all heads at once (block-diag weights)
    feat = jnp.dot(convf_ref[...], wfc_ref[...],
                   preferred_element_type=jnp.float32) + bfc_ref[...]
    feat = jnp.maximum(feat, 0.0).astype(jnp.bfloat16)          # (B, H*latent)

    # l1: shared inner-state dot (lane-packed across heads) + block-diag feat dot
    x = (jnp.dot(inner_ref[...], w1s_ref[...], preferred_element_type=jnp.float32)
         + jnp.dot(feat, w1f_ref[...], preferred_element_type=jnp.float32)
         + b1_ref[...])
    x = jnp.maximum(x, 0.0).astype(jnp.bfloat16)                # (B, H*256)

    # l2
    x = jnp.dot(x, w2_ref[...], preferred_element_type=jnp.float32) + b2_ref[...]
    x = jnp.maximum(x, 0.0).astype(jnp.bfloat16)                # (B, H*256)

    # folded dueling head: Q = x @ Wq + bq, one contiguous store
    q_ref[...] = jnp.dot(x, wq_ref[...],
                         preferred_element_type=jnp.float32) + bq_ref[...]


# ----------------------------------------------------------------------------
# One-time weight packing (hoisted out of the per-step path).
# ----------------------------------------------------------------------------
def _block_diag(w):
    """(H, K, N) -> (H*K, H*N) block-diagonal."""
    H, K, N = w.shape
    out = jnp.zeros((H * K, H * N), w.dtype)
    for h in range(H):
        out = out.at[h * K:(h + 1) * K, h * N:(h + 1) * N].set(w[h])
    return out


def pack_params(params, s_dim):
    bf16 = jnp.bfloat16
    H, _, latent = params['wfc'].shape
    n_actions = params['wa'].shape[2]

    # Dueling fold in f32, single cast to bf16 afterwards:
    #   Q = V + A - mean(A)  ==>  Wq = Wa + Wv - mean_j(Wa),  bq = ba + bv - mean(ba)
    wq = params['wa'] + params['wv'] - jnp.mean(params['wa'], axis=2, keepdims=True)
    bq = params['ba'] + params['bv'] - jnp.mean(params['ba'], axis=2, keepdims=True)

    return {
        # per-head conv params (stay in XLA glue)
        'cw1': params['cw1'], 'cb1': params['cb1'],
        'cw2': params['cw2'], 'cb2': params['cb2'],
        # vision FC (block-diag over heads)
        'wfc_bd': _block_diag(params['wfc']).astype(bf16),          # (H*Fc, H*latent)
        'bfc': params['bfc'].reshape(1, H * latent),                # f32
        # l1: inner-state part lane-packed (shared input), feat part block-diag
        'w1s': jnp.concatenate([params['w1'][h, :s_dim, :] for h in range(H)],
                               axis=1).astype(bf16),                # (s_dim, H*256)
        'w1f_bd': _block_diag(params['w1'][:, s_dim:, :]).astype(bf16),  # (H*latent, H*256)
        'b1': params['b1'].reshape(1, H * HIDDEN),
        # l2
        'w2_bd': _block_diag(params['w2']).astype(bf16),            # (H*256, H*256)
        'b2': params['b2'].reshape(1, H * HIDDEN),
        # folded dueling head
        'wq_bd': _block_diag(wq).astype(bf16),                      # (H*256, H*A)
        'bq': bq.reshape(1, H * n_actions),                         # f32
    }


# ----------------------------------------------------------------------------
# Forward: conv feature extraction (XLA glue) + Pallas hot path.
# ----------------------------------------------------------------------------
def vision_multihead_dueling_q_net(inner_state, outer_state_nchw, packed):
    # TODO(synk): vision_Net's source was not provided; a conv(3x3,s2)->relu ->
    # conv(3x3,s2)->relu -> flatten -> fc -> relu stack is assumed.  Tiny convs
    # stay in plain JAX; everything from the vision FC onward runs in Pallas.
    x = jnp.transpose(outer_state_nchw, (0, 2, 3, 1))               # NCHW -> NHWC
    n_heads = packed['cw1'].shape[0]
    B = inner_state.shape[0]

    feats = []
    for h in range(n_heads):
        y = lax.conv_general_dilated(x, packed['cw1'][h], (2, 2), 'VALID',
                                     dimension_numbers=('NHWC', 'HWIO', 'NHWC'))
        y = jax.nn.relu(y + packed['cb1'][h])
        y = lax.conv_general_dilated(y, packed['cw2'][h], (2, 2), 'VALID',
                                     dimension_numbers=('NHWC', 'HWIO', 'NHWC'))
        # bf16 at the source: cast fused into the conv relu epilogue
        y = jax.nn.relu(y + packed['cb2'][h]).astype(jnp.bfloat16)
        feats.append(y.reshape(B, -1))
    conv_slab = jnp.concatenate(feats, axis=1)                      # (B, H*Fc) bf16

    inner_bf = inner_state.astype(jnp.bfloat16)

    operands = (inner_bf, conv_slab, packed['wfc_bd'], packed['bfc'],
                packed['w1s'], packed['w1f_bd'], packed['b1'],
                packed['w2_bd'], packed['b2'], packed['wq_bd'], packed['bq'])

    HA = packed['bq'].shape[1]
    n_actions = HA // n_heads
    HF = conv_slab.shape[1]
    HL = packed['bfc'].shape[1]
    HH = packed['b1'].shape[1]
    s_dim = inner_state.shape[1]

    flops = 2 * B * (HF * HL + s_dim * HH + HL * HH + HH * HH + HH * HA)
    bytes_accessed = (sum(int(o.size) * o.dtype.itemsize for o in operands)
                      + B * HA * 4)

    vmem = pl.BlockSpec(memory_space=pltpu.MemorySpace.VMEM)
    q2d = pl.pallas_call(
        _dueling_kernel,
        out_shape=jax.ShapeDtypeStruct((B, HA), jnp.float32),
        in_specs=[vmem] * len(operands),
        out_specs=vmem,
        cost_estimate=pl.CostEstimate(flops=flops, transcendentals=0,
                                      bytes_accessed=bytes_accessed),
    )(*operands)

    return q2d.reshape(B, n_heads, n_actions)                       # free row-major reshape


# ----------------------------------------------------------------------------
# Pure-JAX reference (per-head, PyTorch-style). Weights AND activations are
# bf16-round-tripped with f32 accumulation so the comparison matches the
# kernel's deliberate precision regime (apples-to-apples).
# ----------------------------------------------------------------------------
def reference(inner_state, outer_state_nchw, params):
    x = jnp.transpose(outer_state_nchw, (0, 2, 3, 1))
    bf = lambda a: a.astype(jnp.bfloat16)

    def per_head(cw1, cb1, cw2, cb2, wfc, bfc, w1, b1, w2, b2, wv, bv, wa, ba):
        y = lax.conv_general_dilated(x, cw1, (2, 2), 'VALID',
                                     dimension_numbers=('NHWC', 'HWIO', 'NHWC'))
        y = jax.nn.relu(y + cb1)
        y = lax.conv_general_dilated(y, cw2, (2, 2), 'VALID',
                                     dimension_numbers=('NHWC', 'HWIO', 'NHWC'))
        y = jax.nn.relu(y + cb2)
        cf = bf(y.reshape(y.shape[0], -1))
        feat = jax.nn.relu(jnp.dot(cf, bf(wfc),
                                   preferred_element_type=jnp.float32) + bfc)
        s = jnp.concatenate([bf(inner_state), bf(feat)], axis=1)
        h1 = jax.nn.relu(jnp.dot(s, bf(w1),
                                 preferred_element_type=jnp.float32) + b1)
        h2 = jax.nn.relu(jnp.dot(bf(h1), bf(w2),
                                 preferred_element_type=jnp.float32) + b2)
        h2b = bf(h2)
        v = jnp.dot(h2b, bf(wv), preferred_element_type=jnp.float32) + bv
        a = jnp.dot(h2b, bf(wa), preferred_element_type=jnp.float32) + ba
        return v + a - a.mean(axis=1, keepdims=True)

    q = jax.vmap(per_head)(params['cw1'], params['cb1'], params['cw2'], params['cb2'],
                           params['wfc'], params['bfc'], params['w1'], params['b1'],
                           params['w2'], params['b2'], params['wv'], params['bv'],
                           params['wa'], params['ba'])
    return jnp.transpose(q, (1, 0, 2))


def init_params(key, *, n_heads, s_dim, latent_dim, n_actions, cin, conv_flat):
    ks = jax.random.split(key, 16)
    n = jax.random.normal
    in_dim = s_dim + latent_dim
    return {
        # per-head vision_Net convs + fc
        'cw1': n(ks[0], (n_heads, 3, 3, cin, 8), jnp.float32) * 0.1,
        'cb1': jnp.zeros((n_heads, 8), jnp.float32),
        'cw2': n(ks[1], (n_heads, 3, 3, 8, 16), jnp.float32) * 0.1,
        'cb2': jnp.zeros((n_heads, 16), jnp.float32),
        'wfc': n(ks[2], (n_heads, conv_flat, latent_dim), jnp.float32) * 0.05,
        'bfc': jnp.zeros((n_heads, 1, latent_dim), jnp.float32),
        # parallel_Linear l1, l2
        'w1': n(ks[3], (n_heads, in_dim, HIDDEN), jnp.float32) * 0.05,
        'b1': n(ks[4], (n_heads, 1, HIDDEN), jnp.float32) * 0.01,
        'w2': n(ks[5], (n_heads, HIDDEN, HIDDEN), jnp.float32) * 0.05,
        'b2': n(ks[6], (n_heads, 1, HIDDEN), jnp.float32) * 0.01,
        # lV / lA (torch: orthogonal_(0.01) weights, zero bias -> small random, zero bias)
        'wv': n(ks[7], (n_heads, HIDDEN, 1), jnp.float32) * 0.01,
        'bv': jnp.zeros((n_heads, 1, 1), jnp.float32),
        'wa': n(ks[8], (n_heads, HIDDEN, n_actions), jnp.float32) * 0.01,
        'ba': jnp.zeros((n_heads, 1, n_actions), jnp.float32),
    }


if __name__ == "__main__":
    B, C, H_img, W_img = 2, 4, 16, 16
    s_dim, latent_dim, n_heads, n_actions = 8, 24, 3, 4
    # conv1: (16-3)//2+1 = 7 ; conv2: (7-3)//2+1 = 3 ; flat = 16*3*3
    conv_flat = 16 * 3 * 3

    key = jax.random.PRNGKey(0)
    k_in, k_out, k_p = jax.random.split(key, 3)
    inner_state = jax.random.normal(k_in, (B, s_dim), jnp.float32)
    outer_state = jax.random.normal(k_out, (B, C, H_img, W_img), jnp.float32)  # NCHW like PyTorch
    params = init_params(k_p, n_heads=n_heads, s_dim=s_dim, latent_dim=latent_dim,
                         n_actions=n_actions, cin=C, conv_flat=conv_flat)

    # Pack once at parameter-load time (hoisted out of the per-call path).
    packed = pack_params(params, s_dim)

    fwd = jax.jit(vision_multihead_dueling_q_net)
    q = jax.block_until_ready(fwd(inner_state, outer_state, packed))
    assert q.shape == (B, n_heads, n_actions), q.shape

    q_ref = jax.block_until_ready(jax.jit(reference)(inner_state, outer_state, params))
    assert jnp.allclose(q, q_ref, rtol=3e-2, atol=3e-3), (q, q_ref)

    print("KERNEL_OK")
</pallas_src>

<mosaic_0001>
module attributes {stable_mosaic.version = 11 : i64} {
  func.func @_dueling_kernel(%arg0: memref<2x8xbf16, #tpu.memory_space<vmem>>, %arg1: memref<2x432xbf16, #tpu.memory_space<vmem>>, %arg2: memref<432x72xbf16, #tpu.memory_space<vmem>>, %arg3: memref<1x72xf32, #tpu.memory_space<vmem>>, %arg4: memref<8x768xbf16, #tpu.memory_space<vmem>>, %arg5: memref<72x768xbf16, #tpu.memory_space<vmem>>, %arg6: memref<1x768xf32, #tpu.memory_space<vmem>>, %arg7: memref<768x768xbf16, #tpu.memory_space<vmem>>, %arg8: memref<1x768xf32, #tpu.memory_space<vmem>>, %arg9: memref<768x12xbf16, #tpu.memory_space<vmem>>, %arg10: memref<1x12xf32, #tpu.memory_space<vmem>>, %arg11: memref<2x12xf32, #tpu.memory_space<vmem>>) attributes {dimension_semantics = [], scalar_prefetch = 0 : i64, scratch_operands = 0 : i64, tpu.core_type = #tpu.core_type<tc>} {
    %c0 = arith.constant 0 : index
    %c0_0 = arith.constant 0 : index
    %0 = vector.load %arg1[%c0, %c0_0] : memref<2x432xbf16, #tpu.memory_space<vmem>>, vector<2x432xbf16>
    %c0_1 = arith.constant 0 : index
    %c0_2 = arith.constant 0 : index
    %1 = vector.load %arg2[%c0_1, %c0_2] : memref<432x72xbf16, #tpu.memory_space<vmem>>, vector<432x72xbf16>
    %cst = arith.constant dense<0.000000e+00> : vector<2x72xf32>
    %2 = tpu.matmul %0, %1, %cst {dimension_numbers = #tpu.dot_dimension_numbers<[1], [0], [0], [1], [0, 0, 1, 1], [], []>} : vector<2x432xbf16>, vector<432x72xbf16>, vector<2x72xf32> -> vector<2x72xf32>
    %c0_3 = arith.constant 0 : index
    %c0_4 = arith.constant 0 : index
    %3 = vector.load %arg3[%c0_3, %c0_4] : memref<1x72xf32, #tpu.memory_space<vmem>>, vector<1x72xf32>
    %4 = vector.broadcast %3 : vector<1x72xf32> to vector<2x72xf32>
    %5 = arith.addf %2, %4 : vector<2x72xf32>
    %cst_5 = arith.constant 0.000000e+00 : f32
    %6 = vector.broadcast %cst_5 : f32 to vector<2x72xf32>
    %7 = arith.maximumf %5, %6 : vector<2x72xf32>
    %8 = arith.truncf %7 : vector<2x72xf32> to vector<2x72xbf16>
    %c0_6 = arith.constant 0 : index
    %c0_7 = arith.constant 0 : index
    %9 = vector.load %arg0[%c0_6, %c0_7] : memref<2x8xbf16, #tpu.memory_space<vmem>>, vector<2x8xbf16>
    %c0_8 = arith.constant 0 : index
    %c0_9 = arith.constant 0 : index
    %10 = vector.load %arg4[%c0_8, %c0_9] : memref<8x768xbf16, #tpu.memory_space<vmem>>, vector<8x768xbf16>
    %cst_10 = arith.constant dense<0.000000e+00> : vector<2x768xf32>
    %11 = tpu.matmul %9, %10, %cst_10 {dimension_numbers = #tpu.dot_dimension_numbers<[1], [0], [0], [1], [0, 0, 1, 1], [], []>} : vector<2x8xbf16>, vector<8x768xbf16>, vector<2x768xf32> -> vector<2x768xf32>
    %c0_11 = arith.constant 0 : index
    %c0_12 = arith.constant 0 : index
    %12 = vector.load %arg5[%c0_11, %c0_12] : memref<72x768xbf16, #tpu.memory_space<vmem>>, vector<72x768xbf16>
    %cst_13 = arith.constant dense<0.000000e+00> : vector<2x768xf32>
    %13 = tpu.matmul %8, %12, %cst_13 {dimension_numbers = #tpu.dot_dimension_numbers<[1], [0], [0], [1], [0, 0, 1, 1], [], []>} : vector<2x72xbf16>, vector<72x768xbf16>, vector<2x768xf32> -> vector<2x768xf32>
    %14 = arith.addf %11, %13 : vector<2x768xf32>
    %c0_14 = arith.constant 0 : index
    %c0_15 = arith.constant 0 : index
    %15 = vector.load %arg6[%c0_14, %c0_15] : memref<1x768xf32, #tpu.memory_space<vmem>>, vector<1x768xf32>
    %16 = vector.broadcast %15 : vector<1x768xf32> to vector<2x768xf32>
    %17 = arith.addf %14, %16 : vector<2x768xf32>
    %cst_16 = arith.constant 0.000000e+00 : f32
    %18 = vector.broadcast %cst_16 : f32 to vector<2x768xf32>
    %19 = arith.maximumf %17, %18 : vector<2x768xf32>
    %20 = arith.truncf %19 : vector<2x768xf32> to vector<2x768xbf16>
    %c0_17 = arith.constant 0 : index
    %c0_18 = arith.constant 0 : index
    %21 = vector.load %arg7[%c0_17, %c0_18] : memref<768x768xbf16, #tpu.memory_space<vmem>>, vector<768x768xbf16>
    %cst_19 = arith.constant dense<0.000000e+00> : vector<2x768xf32>
    %22 = tpu.matmul %20, %21, %cst_19 {dimension_numbers = #tpu.dot_dimension_numbers<[1], [0], [0], [1], [0, 0, 1, 1], [], []>} : vector<2x768xbf16>, vector<768x768xbf16>, vector<2x768xf32> -> vector<2x768xf32>
    %c0_20 = arith.constant 0 : index
    %c0_21 = arith.constant 0 : index
    %23 = vector.load %arg8[%c0_20, %c0_21] : memref<1x768xf32, #tpu.memory_space<vmem>>, vector<1x768xf32>
    %24 = vector.broadcast %23 : vector<1x768xf32> to vector<2x768xf32>
    %25 = arith.addf %22, %24 : vector<2x768xf32>
    %cst_22 = arith.constant 0.000000e+00 : f32
    %26 = vector.broadcast %cst_22 : f32 to vector<2x768xf32>
    %27 = arith.maximumf %25, %26 : vector<2x768xf32>
    %28 = arith.truncf %27 : vector<2x768xf32> to vector<2x768xbf16>
    %c0_23 = arith.constant 0 : index
    %c0_24 = arith.constant 0 : index
    %29 = vector.load %arg9[%c0_23, %c0_24] : memref<768x12xbf16, #tpu.memory_space<vmem>>, vector<768x12xbf16>
    %cst_25 = arith.constant dense<0.000000e+00> : vector<2x12xf32>
    %30 = tpu.matmul %28, %29, %cst_25 {dimension_numbers = #tpu.dot_dimension_numbers<[1], [0], [0], [1], [0, 0, 1, 1], [], []>} : vector<2x768xbf16>, vector<768x12xbf16>, vector<2x12xf32> -> vector<2x12xf32>
    %c0_26 = arith.constant 0 : index
    %c0_27 = arith.constant 0 : index
    %31 = vector.load %arg10[%c0_26, %c0_27] : memref<1x12xf32, #tpu.memory_space<vmem>>, vector<1x12xf32>
    %32 = vector.broadcast %31 : vector<1x12xf32> to vector<2x12xf32>
    %33 = arith.addf %30, %32 : vector<2x12xf32>
    %c0_28 = arith.constant 0 : index
    %c0_29 = arith.constant 0 : index
    %34 = vector.load %arg11[%c0_28, %c0_29] : memref<2x12xf32, #tpu.memory_space<vmem>>, vector<2x12xf32>
    tpu.vector_store %arg11[%c0_28, %c0_29], %33 {strides = array<i32>} : memref<2x12xf32, #tpu.memory_space<vmem>>, vector<2x12xf32>,
    return
  }
}

</mosaic_0001>

<bundles_post_ra>
// kernel: vision_multihead_dueling_q_net.1
= control target key start
LH: loop header
LB: loop body
LE: loop exit
PB: predicated region body
PF: predicated region fallthrough
CT: control target
= control target key end

     0   :  { %vm496_vm0 = vcmask 1043456   ;;  %vm269_vm1 = vcmask 392192   ;;  %vm492_vm2 = vcmask 588800   ;;  %vm608_vm3 = vcmask 64512   ;;  %s7723_s2 = inlined_call_operand.vmem [shape: bf16[432,72], index: 2, kind: input, shape index: {}]   ;;  %s7724_s1 = inlined_call_operand.vmem [shape: bf16[2,432], index: 1, kind: input, shape index: {}]   ;;  %s7725_s5 = inlined_call_operand.vmem [shape: bf16[72,768], index: 5, kind: input, shape index: {}]   ;;  %s7726_s3 = inlined_call_operand.vmem [shape: f32[1,72], index: 3, kind: input, shape index: {}]   ;;  %s7727_s4 = inlined_call_operand.vmem [shape: bf16[8,768], index: 4, kind: input, shape index: {}]   ;;  %s7728_s0 = inlined_call_operand.vmem [shape: bf16[2,8], index: 0, kind: input, shape index: {}]   ;;  %s7729_s7 = inlined_call_operand.vmem [shape: bf16[768,768], index: 7, kind: input, shape index: {}]   ;;  %s7730_s6 = inlined_call_operand.vmem [shape: f32[1,768], index: 6, kind: input, shape index: {}]   ;;  %s7731_s8 = inlined_call_operand.vmem [shape: f32[1,768], index: 8, kind: input, shape index: {}]   ;;  %s7732_s9 = inlined_call_operand.vmem [shape: bf16[768,12], index: 9, kind: input, shape index: {}]   ;;  %s7733_s10 = inlined_call_operand.vmem [shape: f32[1,12], index: 10, kind: input, shape index: {}]   ;;  %s7734_s11 = inlined_call_operand.vmem [shape: f32[2,12], index: 11, kind: output, shape index: {}]  }
   0x1   :  { %v5002_v0 = vld [vmem:[%s7723_s2 + $0x38] sm:$0xff]  ;;  %v5001_v3 = vld [vmem:[%s7723_s2 + $0x30] sm:$0xff]  ;;  %v5000_v7 = vld [vmem:[%s7723_s2 + $0x28] sm:$0xff]  ;;  %vm3428_vm4 = vcmask 91136  }
   0x2   :  { %v5010_v1 = vld [vmem:[%s7723_s2 + $0x78] sm:$0xff]  ;;  %272 = vmatpush.bf16.msra.mxu0 %v5002_v0  ;;  %v5009_v4 = vld [vmem:[%s7723_s2 + $0x70] sm:$0xff]  ;;  %v5008_v8 = vld [vmem:[%s7723_s2 + $0x68] sm:$0xff] }
   0x3   :  { %v5018_v2 = vld [vmem:[%s7723_s2 + $0xb8] sm:$0xff]  ;;  %285 = vmatpush.bf16.msra.mxu1 %v5010_v1  ;;  %v5017_v5 = vld [vmem:[%s7723_s2 + $0xb0] sm:$0xff]  ;;  %v5016_v9 = vld [vmem:[%s7723_s2 + $0xa8] sm:$0xff] }
   0x4   :  { %298 = vmatpush.bf16.msra.mxu2 %v5018_v2  ;;  %v5021_v6 = vld [vmem:[%s7723_s2 + $0xd0] sm:$0xff]  ;;  %v5020_v10 = vld [vmem:[%s7723_s2 + $0xc8] sm:$0xff]  ;;  %v39_v11 = vld [vmem:[%s7724_s1] sm:$0xf] }
   0x5   :  { %316 = vmatpush.bf16.msra.mxu3 %v5021_v6  ;;  %99 = vst [vmem:[#allocation1] ss:$9 sm:$0xff] %v39_v11  ;;  %v354_v12 = vld [vmem:[%s7725_s5 + $0xc0] sm:$0xff]  ;;  %v3617_v19 = vld [vmem:[%s7725_s5 + $0x90] sm:$0xf]  ;;  %v4998_v21 = vld [vmem:[%s7723_s2 + $0x18] sm:$0xff] }
   0x6   :  { %273 = vmatpush.bf16.msra.mxu0 %v5001_v3  ;;  %v4999_v13 = vld [vmem:[%s7723_s2 + $0x20] sm:$0xff]  ;;  %v432_v15 = vunpack.c.l.b16 %v354_v12  ;;  %v5043_v20 = vld [vmem:[%s7725_s5 + $0xa4] sm:$0xf0]  ;;  %v5006_v22 = vld [vmem:[%s7723_s2 + $0x58] sm:$0xff]  ;;  %v433_v31 = vunpack.c.h.b16 %v354_v12 }
   0x7   :  { %286 = vmatpush.bf16.msra.mxu1 %v5009_v4  ;;  %v5007_v14 = vld [vmem:[%s7723_s2 + $0x60] sm:$0xff]  ;;  %v5014_v24 = vld [vmem:[%s7723_s2 + $0x98] sm:$0xff]  ;;  %v3618_v26 = vor.u32 %v5043_v20, %v3617_v19  ;;  %v4997_v27 = vld [vmem:[%s7723_s2 + $0x10] sm:$0xff] }
   0x8   :  { %299 = vmatpush.bf16.msra.mxu2 %v5017_v5  ;;  %v5015_v16 = vld [vmem:[%s7723_s2 + $0xa0] sm:$0xff]  ;;  %v462_v18 = vpack.c.b16 %v432_v15, %v432_v15  ;;  %v5005_v28 = vld [vmem:[%s7723_s2 + $0x50] sm:$0xff]  ;;  %v355_v29 = vld [vmem:[%s7725_s5 + $0xc8] sm:$0xff]  ;;  %v463_v37 = vpack.c.b16 %v433_v31, %v433_v31 }
   0x9   :  { %317 = vmatpush.bf16.msra.mxu3 %v5020_v10  ;;  %v5019_v17 = vld [vmem:[%s7723_s2 + $0xc0] sm:$0xff]  ;;  %v5013_v30 = vld [vmem:[%s7723_s2 + $0x90] sm:$0xff]  ;;  %v434_v32 = vunpack.c.l.b16 %v355_v29  ;;  %v435_v33 = vunpack.c.h.b16 %v355_v29  ;;  %v4996_v34 = vld [vmem:[%s7723_s2 + $0x8] sm:$0xff] }
   0xa   :  { %274 = vmatpush.bf16.msra.mxu0 %v5000_v7  ;;  %v498_v23 = vsel %vm496_vm0, %v462_v18, 0  ;;  %v5004_v35 = vld [vmem:[%s7723_s2 + $0x48] sm:$0xff]  ;;  %v4995_v40 = vld [vmem:[%s7723_s2] sm:$0xff]  ;;  %v501_v43 = vsel %vm496_vm0, %v463_v37, 0  ;;  %v5040_v44 = vld [vmem:[%s7725_s5 + $0x94] sm:$0xf] }
   0xb   :  { %287 = vmatpush.bf16.msra.mxu1 %v5008_v8  ;;  %v5012_v36 = vld [vmem:[%s7723_s2 + $0x88] sm:$0xff]  ;;  %v464_v38 = vpack.c.b16 %v434_v32, %v434_v32  ;;  %v465_v39 = vpack.c.b16 %v435_v33, %v435_v33  ;;  %v5003_v41 = vld [vmem:[%s7723_s2 + $0x40] sm:$0xff]  ;;  %v3625_v52 = vld [vmem:[%s7725_s5 + $0x98] sm:$0xf] }
   0xc   :  { %300 = vmatpush.bf16.msra.mxu2 %v5016_v9  ;;  %v103_v25 = vld [vmem:[#allocation1 + $0x1b] sm:$0xff]  ;;  %v3619_v45 = vld [vmem:[%s7725_s5 + $0xa8] sm:$0xf0]  ;;  %v102_v50 = vld [vmem:[#allocation1 + $0x12] sm:$0xff] }
   0xd   :  { %318 = vmatpush.bf16.msra.mxu3 %v5019_v17  ;;  %v5011_v42 = vld [vmem:[%s7723_s2 + $0x80] sm:$0xff]  ;;  %v504_v46 = vsel %vm496_vm0, %v464_v38, 0  ;;  %v507_v47 = vsel %vm496_vm0, %v465_v39, 0  ;;  %v101_v49 = vld [vmem:[#allocation1 + $0x9] sm:$0xff]  ;;  %v3622_v51 = vor.u32 %v5040_v44, %v3619_v45  ;;  %v5041_v54 = vld [vmem:[%s7725_s5 + $0x9c] sm:$0xf] }
   0xe   :  { %275 = vmatpush.bf16.msra.mxu0 %v4999_v13  ;;  %v100_v48 = vld [vmem:[#allocation1] sm:$0xff]  ;;  %v5044_v53 = vld [vmem:[%s7725_s5 + $0xac] sm:$0xf0]  ;;  %v3627_v56 = vld [vmem:[%s7725_s5 + $0xb0] sm:$0xf0] }
   0xf   :  { %288 = vmatpush.bf16.msra.mxu1 %v5007_v14  ;;  %v3626_v55 = vor.u32 %v5044_v53, %v3625_v52  ;;  %v3630_v57 = vor.u32 %v5041_v54, %v3627_v56  ;;  %v3593_v58 = vld [vmem:[%s7725_s5 + $0x60] sm:$0xf]  ;;  %v5037_v59 = vld [vmem:[%s7725_s5 + $0x74] sm:$0xf0]  ;;  %v5034_v60 = vld [vmem:[%s7725_s5 + $0x64] sm:$0xf] }
  0x10   :  { %301 = vmatpush.bf16.msra.mxu2 %v5015_v16  ;;  %3542 = vmatmul.msk.bf16.vlgmr.msra.gmra.mxu3 %vm269_vm1, %v103_v25  ;;  %v3594_v61 = vor.u32 %v5037_v59, %v3593_v58  ;;  %v3595_v62 = vld [vmem:[%s7725_s5 + $0x78] sm:$0xf0]  ;;  %v3601_v63 = vld [vmem:[%s7725_s5 + $0x68] sm:$0xf]  ;;  %v5038_v0 = vld [vmem:[%s7725_s5 + $0x7c] sm:$0xf0] }
  0x11   :  { %518 = vmatpush.bf16.msrb.mxu3 %v498_v23  ;;  %v3598_v1 = vor.u32 %v5034_v60, %v3595_v62  ;;  %v3602_v2 = vor.u32 %v5038_v0, %v3601_v63  ;;  %v5035_v3 = vld [vmem:[%s7725_s5 + $0x6c] sm:$0xf]  ;;  %v3603_v4 = vld [vmem:[%s7725_s5 + $0x80] sm:$0xf0]  ;;  %v3569_v6 = vld [vmem:[%s7725_s5 + $0x30] sm:$0xf] }
  0x12   :  { %276 = vmatpush.bf16.msra.mxu0 %v4998_v21  ;;  %v3606_v5 = vor.u32 %v5035_v3, %v3603_v4  ;;  %v5031_v7 = vld [vmem:[%s7725_s5 + $0x44] sm:$0xf0]  ;;  %v5028_v8 = vld [vmem:[%s7725_s5 + $0x34] sm:$0xf]  ;;  %v3571_v10 = vld [vmem:[%s7725_s5 + $0x48] sm:$0xf0] }
  0x13   :  { %289 = vmatpush.bf16.msra.mxu1 %v5006_v22  ;;  %v3570_v9 = vor.u32 %v5031_v7, %v3569_v6  ;;  %v3577_v11 = vld [vmem:[%s7725_s5 + $0x38] sm:$0xf]  ;;  %v5032_v12 = vld [vmem:[%s7725_s5 + $0x4c] sm:$0xf0]  ;;  %v3574_v13 = vor.u32 %v5028_v8, %v3571_v10  ;;  %v5029_v15 = vld [vmem:[%s7725_s5 + $0x3c] sm:$0xf] }
  0x14   :  { %302 = vmatpush.bf16.msra.mxu2 %v5014_v24  ;;  %v3578_v14 = vor.u32 %v5032_v12, %v3577_v11  ;;  %v3579_v16 = vld [vmem:[%s7725_s5 + $0x50] sm:$0xf0]  ;;  %v3545_v21 = vld [vmem:[%s7725_s5] sm:$0xf]  ;;  %v5025_v22 = vld [vmem:[%s7725_s5 + $0x14] sm:$0xf0] }
  0x15   :  { %519 = vmatpush.bf16.msrb.mxu3 %v3618_v26  ;;  %v356_v17 = vld [vmem:[%s7725_s5 + $0xd0] sm:$0xff]  ;;  %v3582_v18 = vor.u32 %v5029_v15, %v3579_v16  ;;  %v5022_v23 = vld [vmem:[%s7725_s5 + $0x4] sm:$0xf]  ;;  %v3546_v24 = vor.u32 %v5025_v22, %v3545_v21  ;;  %v3547_v25 = vld [vmem:[%s7725_s5 + $0x18] sm:$0xf0] }
  0x16   :  { %277 = vmatpush.bf16.msra.mxu0 %v4997_v27  ;;  %v436_v19 = vunpack.c.l.b16 %v356_v17  ;;  %v437_v20 = vunpack.c.h.b16 %v356_v17  ;;  %v3553_v26 = vld [vmem:[%s7725_s5 + $0x8] sm:$0xf]  ;;  %v5026_v27 = vld [vmem:[%s7725_s5 + $0x1c] sm:$0xf0]  ;;  %v5023_v32 = vld [vmem:[%s7725_s5 + $0xc] sm:$0xf] }
  0x17   :  { %290 = vmatpush.bf16.msra.mxu1 %v5005_v28  ;;  %v3554_v31 = vor.u32 %v5026_v27, %v3553_v26  ;;  %v3555_v33 = vld [vmem:[%s7725_s5 + $0x20] sm:$0xf0]  ;;  %v3633_v37 = vld [vmem:[%s7725_s5 + $0xa0] sm:$0xf]  ;;  %v5045_v38 = vld [vmem:[%s7725_s5 + $0xb4] sm:$0xf0] }
  0x18   :  { %303 = vmatpush.bf16.msra.mxu2 %v5013_v30  ;;  %v466_v28 = vpack.c.b16 %v436_v19, %v436_v19  ;;  %v467_v29 = vpack.c.b16 %v437_v20, %v437_v20  ;;  %v3550_v30 = vor.u32 %v5022_v23, %v3547_v25  ;;  %v3634_v39 = vor.u32 %v5045_v38, %v3633_v37  ;;  %v5039_v44 = vld [vmem:[%s7725_s5 + $0x84] sm:$0xf0]  ;;  %v5036_v45 = vld [vmem:[%s7725_s5 + $0x74] sm:$0xf]  ;;  %v3587_v52 = vld [vmem:[%s7725_s5 + $0x58] sm:$0xf0] }
  0x19   :  { %520 = vmatpush.bf16.msrb.mxu3 %v3594_v61  ;;  %v327_v53 = vld [vmem:[%s7727_s4] sm:$0xff]  ;;  %v328_v54 = vld [vmem:[%s7727_s4 + $0x8] sm:$0xff]  ;;  %v3561_v59 = vld [vmem:[%s7725_s5 + $0x10] sm:$0xf] }
  0x1a   :  { %278 = vmatpush.bf16.msra.mxu0 %v4996_v34  ;;  %v3558_v34 = vor.u32 %v5023_v32, %v3555_v33  ;;  %v596_v56 = vunpack.c.l.b16 %v327_v53  ;;  %v5027_v60 = vld [vmem:[%s7725_s5 + $0x24] sm:$0xf0]  ;;  %v5024_v62 = vld [vmem:[%s7725_s5 + $0x14] sm:$0xf]  ;;  %v3563_v63 = vld [vmem:[%s7725_s5 + $0x28] sm:$0xf0] }
  0x1b   :  { %291 = vmatpush.bf16.msra.mxu1 %v5004_v35  ;;  %v510_v35 = vsel %vm496_vm0, %v466_v28, 0  ;;  %v5382_v6 = vld [vmem:[%s7726_s3] ss:$0 sm:$0xff]  ;;  %v329_v26 = vld [vmem:[%s7727_s4 + $0x10] sm:$0xff]  ;;  %v5085_v38 = vld [vmem:[%s7729_s7 + $0x134] sm:$0xf0] }
  0x1c   :  { %304 = vmatpush.bf16.msra.mxu2 %v5012_v36  ;;  %v513_v36 = vsel %vm496_vm0, %v467_v29, 0  ;;  %v602_v0 = vpack.c.b16 %v596_v56, %v596_v56  ;;  %v600_v27 = vunpack.c.l.b16 %v329_v26  ;;  %v601_v28 = vunpack.c.h.b16 %v329_v26  ;;  %v3797_v37 = vld [vmem:[%s7729_s7 + $0x120] sm:$0xf] }
  0x1d   :  { %521 = vmatpush.bf16.msrb.mxu3 %v3570_v9  ;;  %v4373_v56 = vld [vmem:[%s7729_s7 + $0x5a0] sm:$0xf] }
  0x1e   :  { %279 = vmatpush.bf16.msra.mxu0 %v4995_v40  ;;  %v5042_v40 = vld [vmem:[%s7725_s5 + $0xa4] sm:$0xf]  ;;  %v613_v3 = vsel %vm496_vm0, %v602_v0, 0  ;;  %v606_v29 = vpack.c.b16 %v600_v27, %v600_v27  ;;  %v4181_v0 = vld [vmem:[%s7729_s7 + $0x420] sm:$0xf] }
  0x1f   :  { %292 = vmatpush.bf16.msra.mxu1 %v5003_v41  ;;  %v3635_v41 = vld [vmem:[%s7725_s5 + $0xb8] sm:$0xf0]  ;;  %v4229_v27 = vld [vmem:[%s7729_s7 + $0x480] sm:$0xf] }
  0x20   :  { %305 = vmatpush.bf16.msra.mxu2 %v5011_v42  ;;  %v3638_v42 = vor.u32 %v5042_v40, %v3635_v41  ;;  %v625_v32 = vsel %vm496_vm0, %v606_v29, 0  ;;  %v3773_v40 = vld [vmem:[%s7729_s7 + $0xf0] sm:$0xf]  ;;  %v5079_v41 = vld [vmem:[%s7729_s7 + $0x104] sm:$0xf0] }
  0x21   :  { %280 = vmatmul.bf16.vlgmr.msra.gmra.mxu0 %v100_v48  ;;  %522 = vmatpush.bf16.msrb.mxu3 %v3546_v24  ;;  %v5136_v29 = vld [vmem:[%s7729_s7 + $0x2d4] sm:$0xf] }
  0x22   :  { %531 = vmatpush.bf16.msrb.mxu0 %v501_v43  ;;  %293 = vmatmul.bf16.vlgmr.msra.gmra.mxu1 %v101_v49  ;;  %v3609_v43 = vld [vmem:[%s7725_s5 + $0x70] sm:$0xf]  ;;  %v3585_v49 = vld [vmem:[%s7725_s5 + $0x40] sm:$0xf] }
  0x23   :  { %544 = vmatpush.bf16.msrb.mxu1 %v504_v46  ;;  %306 = vmatmul.bf16.vlgmr.msra.gmra.mxu2 %v102_v50  ;;  %v3610_v46 = vor.u32 %v5039_v44, %v3609_v43  ;;  %v5033_v50 = vld [vmem:[%s7725_s5 + $0x54] sm:$0xf0]  ;;  %v5139_v43 = vld [vmem:[%s7729_s7 + $0x2e4] sm:$0xf0]  ;;  %v4397_v44 = vld [vmem:[%s7729_s7 + $0x5d0] sm:$0xf] }
  0x24   :  { %557 = vmatpush.bf16.msrb.mxu2 %v507_v47  ;;  %v3611_v47 = vld [vmem:[%s7725_s5 + $0x88] sm:$0xf0] }
  0x25   :  { %570 = vmatpush.bf16.msra.mxu3 %v510_v35  ;;  %v3614_v48 = vor.u32 %v5036_v45, %v3611_v47  ;;  %v5091_v35 = vld [vmem:[%s7729_s7 + $0x164] sm:$0xf0]  ;;  %v3774_v47 = vor.u32 %v5079_v41, %v3773_v40 }
  0x26   :  { %532 = vmatpush.bf16.msrb.mxu0 %v3622_v51  ;;  %v5030_v51 = vld [vmem:[%s7725_s5 + $0x44] sm:$0xf]  ;;  %v5235_v45 = vld [vmem:[%s7729_s7 + $0x5e4] sm:$0xf0] }
  0x27   :  { %545 = vmatpush.bf16.msrb.mxu1 %v3626_v55  ;;  %v3586_v55 = vor.u32 %v5033_v50, %v3585_v49  ;;  %v3590_v58 = vor.u32 %v5030_v51, %v3587_v52  ;;  %v3989_v49 = vld [vmem:[%s7729_s7 + $0x2a0] sm:$0xf]  ;;  %v5133_v50 = vld [vmem:[%s7729_s7 + $0x2b4] sm:$0xf0]  ;;  %v4205_v52 = vld [vmem:[%s7729_s7 + $0x450] sm:$0xf] }
  0x28   :  { %558 = vmatpush.bf16.msrb.mxu2 %v3630_v57  ;;  %v599_v57 = vunpack.c.h.b16 %v328_v54  ;;  %v5073_v51 = vld [vmem:[%s7729_s7 + $0xd4] sm:$0xf0] }
  0x29   :  { %571 = vmatpush.bf16.msra.mxu3 %v3634_v39  ;;  %v3798_v39 = vor.u32 %v5085_v38, %v3797_v37  ;;  %v3991_v37 = vld [vmem:[%s7729_s7 + $0x2b8] sm:$0xf0]  ;;  %v3941_v38 = vld [vmem:[%s7729_s7 + $0x240] sm:$0xf] }
  0x2a   :  { %533 = vmatpush.bf16.msrb.mxu0 %v3598_v1  ;;  %v605_v1 = vpack.c.b16 %v599_v57, %v599_v57  ;;  %v5229_v57 = vld [vmem:[%s7729_s7 + $0x5b4] sm:$0xf0] }
  0x2b   :  { %546 = vmatpush.bf16.msrb.mxu1 %v3602_v2  ;;  %v3562_v2 = vor.u32 %v5027_v60, %v3561_v59  ;;  %v3725_v60 = vld [vmem:[%s7729_s7 + $0x90] sm:$0xf] }
  0x2c   :  { %559 = vmatpush.bf16.msrb.mxu2 %v3606_v5  ;;  %v622_v4 = vsel %vm496_vm0, %v605_v1, 0  ;;  %v3566_v5 = vor.u32 %v5024_v62, %v3563_v63  ;;  %v5127_v62 = vld [vmem:[%s7729_s7 + $0x284] sm:$0xf0]  ;;  %v5181_v1 = vld [vmem:[%s7729_s7 + $0x434] sm:$0xf0] }
  0x2d   :  { %572 = vmatpush.bf16.msra.mxu3 %v3610_v46  ;;  %v5067_v63 = vld [vmem:[%s7729_s7 + $0xa4] sm:$0xf0] }
  0x2e   :  { %534 = vmatpush.bf16.msrb.mxu0 %v3574_v13  ;;  %v597_v13 = vunpack.c.h.b16 %v327_v53  ;;  %v5187_v53 = vld [vmem:[%s7729_s7 + $0x464] sm:$0xf0] }
  0x2f   :  { %547 = vmatpush.bf16.msrb.mxu1 %v3578_v14  ;;  %v598_v14 = vunpack.c.l.b16 %v328_v54  ;;  %v3990_v54 = vor.u32 %v5133_v50, %v3989_v49  ;;  %v4206_v59 = vor.u32 %v5187_v53, %v4205_v52  ;;  %v3967_v49 = vld [vmem:[%s7729_s7 + $0x288] sm:$0xf0]  ;;  %v3917_v50 = vld [vmem:[%s7729_s7 + $0x210] sm:$0xf] }
  0x30   :  { %560 = vmatpush.bf16.msrb.mxu2 %v3582_v18  ;;  %v603_v19 = vpack.c.b16 %v597_v13, %v597_v13  ;;  %v4325_v13 = vld [vmem:[%s7729_s7 + $0x540] sm:$0xf] }
  0x31   :  { %573 = vmatpush.bf16.msra.mxu3 %v3586_v55  ;;  %v604_v20 = vpack.c.b16 %v598_v14, %v598_v14  ;;  %v4398_v55 = vor.u32 %v5235_v45, %v4397_v44  ;;  %v5217_v14 = vld [vmem:[%s7729_s7 + $0x554] sm:$0xf0]  ;;  %v3653_v45 = vld [vmem:[%s7729_s7] sm:$0xf] }
  0x32   :  { %535 = vmatpush.bf16.msrb.mxu0 %v3550_v30  ;;  %v616_v24 = vsel %vm496_vm0, %v603_v19, 0  ;;  %v607_v30 = vpack.c.b16 %v601_v28, %v601_v28  ;;  %v5211_v19 = vld [vmem:[%s7729_s7 + $0x524] sm:$0xf0]  ;;  %v5193_v28 = vld [vmem:[%s7729_s7 + $0x494] sm:$0xf0] }
  0x33   :  { %548 = vmatpush.bf16.msrb.mxu1 %v3554_v31  ;;  %v619_v25 = vsel %vm496_vm0, %v604_v20, 0  ;;  %v5711_v31 = vld [vmem:[%s7728_s0] sm:$0x1] }
  0x34   :  { %561 = vmatpush.bf16.msrb.mxu2 %v3558_v34  ;;  %v628_v33 = vsel %vm496_vm0, %v607_v30, 0  ;;  %v3821_v34 = vld [vmem:[%s7729_s7 + $0x150] sm:$0xf]  ;;  %v4015_v30 = vld [vmem:[%s7729_s7 + $0x2e8] sm:$0xf0] }
  0x35   :  { %574 = vmatpush.bf16.msra.mxu3 %v3562_v2 }
  0x36   :  { %583 = vmatpush.bf16.msra.mxu0 %v513_v36  ;;  %v3822_v36 = vor.u32 %v5091_v35, %v3821_v34  ;;  %v5055_v34 = vld [vmem:[%s7729_s7 + $0x44] sm:$0xf0]  ;;  %v5130_v35 = vld [vmem:[%s7729_s7 + $0x2a4] sm:$0xf] }
  0x37   :  { %676 = vmatpush.bf16.msra.mxu1 %v622_v4  ;;  %v4349_v4 = vld [vmem:[%s7729_s7 + $0x570] sm:$0xf]  ;;  %v3994_v40 = vor.u32 %v5130_v35, %v3991_v37  ;;  %v5088_v35 = vld [vmem:[%s7729_s7 + $0x154] sm:$0xf] }
  0x38   :  { %637 = vmatpush.bf16.msra.mxu2 %v613_v3  ;;  %v4374_v3 = vor.u32 %v5229_v57, %v4373_v56  ;;  %v4589_v56 = vld [vmem:[%s7729_s7 + $0x750] sm:$0xf] }
  0x3a   :  { %584 = vmatpush.bf16.msra.mxu0 %v3638_v42  ;;  %v4013_v42 = vld [vmem:[%s7729_s7 + $0x2d0] sm:$0xf] }
  0x3b   :  { %v4014_v46 = vor.u32 %v5139_v43, %v4013_v42  ;;  %v4133_v42 = vld [vmem:[%s7729_s7 + $0x3c0] sm:$0xf]  ;;  %v5169_v43 = vld [vmem:[%s7729_s7 + $0x3d4] sm:$0xf0] }
  0x3c   :  { %v4134_v44 = vor.u32 %v5169_v43, %v4133_v42  ;;  %v5259_v42 = vld [vmem:[%s7729_s7 + $0x6a4] sm:$0xf0]  ;;  %v4757_v43 = vld [vmem:[%s7729_s7 + $0x8a0] sm:$0xf] }
  0x3e   :  { %585 = vmatpush.bf16.msra.mxu0 %v3614_v48  ;;  %v3749_v48 = vld [vmem:[%s7729_s7 + $0xc0] sm:$0xf] }
  0x42   :  { %586 = vmatpush.bf16.msra.mxu0 %v3590_v58  ;;  %v3750_v58 = vor.u32 %v5073_v51, %v3749_v48  ;;  %v5115_v51 = vld [vmem:[%s7729_s7 + $0x224] sm:$0xf0] }
  0x43   :  { %v3918_v53 = vor.u32 %v5115_v51, %v3917_v50  ;;  %v5094_v50 = vld [vmem:[%s7729_s7 + $0x184] sm:$0xf]  ;;  %v3847_v51 = vld [vmem:[%s7729_s7 + $0x198] sm:$0xf0] }
  0x46   :  { %587 = vmatpush.bf16.msra.mxu0 %v3566_v5  ;;  %v5223_v5 = vld [vmem:[%s7729_s7 + $0x584] sm:$0xf0] }
  0x93   :  { %v320_v61 = vpop.f32.mrf.mxu3 }
  0x9b   :  { %v322_v10 = vpop.f32.mrf.mxu3 }
  0x9c   :  { %v4157_v10 = vld [vmem:[%s7729_s7 + $0x3f0] sm:$0xf] }
  0x9e   :  { %v281_v7 = vpop.f32.mrf.mxu0 }
  0x9f   :  { %v294_v8 = vpop.f32.mrf.mxu1  ;;  %v282_v9 = vadd.f32 %v5382_v6, %v281_v7  ;;  %v3726_v6 = vor.u32 %v5067_v63, %v3725_v60  ;;  %v4182_v7 = vor.u32 %v5181_v1, %v4181_v0  ;;  %v5118_v60 = vld [vmem:[%s7729_s7 + $0x244] sm:$0xf]  ;;  %v3893_v63 = vld [vmem:[%s7729_s7 + $0x1e0] sm:$0xf]  ;;  %v5109_v0 = vld [vmem:[%s7729_s7 + $0x1f4] sm:$0xf0] }
  0xa0   :  { %v4085_v1 = vld [vmem:[%s7729_s7 + $0x360] sm:$0xf] }
  0xa1   :  { %v295_v11 = vadd.f32 %v294_v8, %v282_v9  ;;  %v3701_v8 = vld [vmem:[%s7729_s7 + $0x60] sm:$0xf]  ;;  %v5061_v9 = vld [vmem:[%s7729_s7 + $0x74] sm:$0xf0] }
  0xa6   :  { %v307_v12 = vpop.f32.mrf.mxu2  ;;  %v283_v16 = vpop.f32.mrf.mxu0 }
  0xa7   :  { %v308_v15 = vadd.f32 %v307_v12, %v295_v11  ;;  %v296_v17 = vpop.f32.mrf.mxu1  ;;  %v5175_v11 = vld [vmem:[%s7729_s7 + $0x404] sm:$0xf0]  ;;  %v4350_v12 = vor.u32 %v5223_v5, %v4349_v4  ;;  %v4565_v4 = vld [vmem:[%s7729_s7 + $0x720] sm:$0xf]  ;;  %v5277_v5 = vld [vmem:[%s7729_s7 + $0x734] sm:$0xf0] }
  0xa8   :  { %v4158_v16 = vor.u32 %v5175_v11, %v4157_v10  ;;  %v4326_v17 = vor.u32 %v5217_v14, %v4325_v13  ;;  %v3869_v10 = vld [vmem:[%s7729_s7 + $0x1b0] sm:$0xf]  ;;  %v5151_v14 = vld [vmem:[%s7729_s7 + $0x344] sm:$0xf0] }
  0xa9   :  { %v321_v18 = vadd.f32 %v320_v61, %v308_v15  ;;  %v3965_v61 = vld [vmem:[%s7729_s7 + $0x270] sm:$0xf]  ;;  %v3702_v15 = vor.u32 %v5061_v9, %v3701_v8  ;;  %v5112_v8 = vld [vmem:[%s7729_s7 + $0x214] sm:$0xf]  ;;  %v3919_v9 = vld [vmem:[%s7729_s7 + $0x228] sm:$0xf0] }
  0xaa   :  { %v3966_v2 = vor.u32 %v5127_v62, %v3965_v61  ;;  %v3943_v61 = vld [vmem:[%s7729_s7 + $0x258] sm:$0xf0]  ;;  %v3922_v11 = vor.u32 %v5112_v8, %v3919_v9  ;;  %v4061_v13 = vld [vmem:[%s7729_s7 + $0x330] sm:$0xf]  ;;  %v4421_v8 = vld [vmem:[%s7729_s7 + $0x600] sm:$0xf] }
  0xab   :  { %v324_v21 = vmax.f32 %v321_v18, 0.0  ;;  %v4301_v18 = vld [vmem:[%s7729_s7 + $0x510] sm:$0xf]  ;;  %v3946_v62 = vor.u32 %v5118_v60, %v3943_v61  ;;  %v3775_v60 = vld [vmem:[%s7729_s7 + $0x108] sm:$0xf0] }
  0xac   :  { %v4302_v20 = vor.u32 %v5211_v19, %v4301_v18  ;;  %v5271_v18 = vld [vmem:[%s7729_s7 + $0x704] sm:$0xf0]  ;;  %v5241_v9 = vld [vmem:[%s7729_s7 + $0x614] sm:$0xf0] }
  0xad   :  { %v325_v22 = vpack.c.bf16 %v324_v21, %v324_v21  ;;  %v4277_v21 = vld [vmem:[%s7729_s7 + $0x4e0] sm:$0xf] }
  0xae   :  { %v309_v23 = vpop.f32.mrf.mxu2 }
  0xaf   :  { %3639 = vmatmul.msk.bf16.vlgmr.msrb.gmra.mxu3 %vm492_vm2, %v325_v22  ;;  %3640 = vmatmul.msk.bf16.vlgmr.msrb.gmra.mxu0 %vm492_vm2, %v325_v22 }
  0xb0   :  { %3641 = vmatmul.msk.bf16.vlgmr.msrb.gmra.mxu1 %vm492_vm2, %v325_v22  ;;  %3642 = vmatmul.msk.bf16.vlgmr.msrb.gmra.mxu2 %vm492_vm2, %v325_v22 }
  0xb1   :  { %650 = vmatpush.bf16.msrb.mxu2 %v616_v24  ;;  %663 = vmatpush.bf16.msrb.mxu3 %v619_v25  ;;  %v4253_v24 = vld [vmem:[%s7729_s7 + $0x4b0] sm:$0xf]  ;;  %v5199_v25 = vld [vmem:[%s7729_s7 + $0x4c4] sm:$0xf0] }
  0xb2   :  { %2482 = vmatpush.bf16.msrb.mxu0 %v3822_v36  ;;  %2495 = vmatpush.bf16.msrb.mxu1 %v4014_v46  ;;  %v4254_v26 = vor.u32 %v5199_v25, %v4253_v24  ;;  %v5049_v46 = vld [vmem:[%s7729_s7 + $0x14] sm:$0xf0]  ;;  %v4037_v25 = vld [vmem:[%s7729_s7 + $0x300] sm:$0xf] }
  0xb3   :  { %v3654_v48 = vor.u32 %v5049_v46, %v3653_v45  ;;  %v5097_v24 = vld [vmem:[%s7729_s7 + $0x194] sm:$0xf0] }
  0xb6   :  { %2483 = vmatpush.bf16.msrb.mxu0 %v3798_v39  ;;  %2496 = vmatpush.bf16.msrb.mxu1 %v3990_v54  ;;  %v5121_v39 = vld [vmem:[%s7729_s7 + $0x254] sm:$0xf0]  ;;  %v4109_v54 = vld [vmem:[%s7729_s7 + $0x390] sm:$0xf] }
  0xb7   :  { %v3942_v41 = vor.u32 %v5121_v39, %v3941_v38  ;;  %v5100_v38 = vld [vmem:[%s7729_s7 + $0x1b4] sm:$0xf]  ;;  %v3871_v39 = vld [vmem:[%s7729_s7 + $0x1c8] sm:$0xf0] }
  0xba   :  { %2484 = vmatpush.bf16.msrb.mxu0 %v3774_v47  ;;  %2497 = vmatpush.bf16.msrb.mxu1 %v3966_v2  ;;  %v5124_v47 = vld [vmem:[%s7729_s7 + $0x274] sm:$0xf]  ;;  %v3894_v2 = vor.u32 %v5109_v0, %v3893_v63  ;;  %v5247_v63 = vld [vmem:[%s7729_s7 + $0x644] sm:$0xf0] }
  0xbb   :  { %v3970_v52 = vor.u32 %v5124_v47, %v3967_v49  ;;  %v5082_v47 = vld [vmem:[%s7729_s7 + $0x124] sm:$0xf] }
  0xbe   :  { %2485 = vmatpush.bf16.msrb.mxu0 %v3750_v58  ;;  %2498 = vmatpush.bf16.msrb.mxu1 %v3942_v41  ;;  %v5283_v58 = vld [vmem:[%s7729_s7 + $0x764] sm:$0xf0]  ;;  %v3874_v41 = vor.u32 %v5100_v38, %v3871_v39 }
  0xbf   :  { %3643 = vmatmul.msk.bf16.vlgmr.msra.gmra.mxu3 %vm492_vm2, %v325_v22  ;;  %3644 = vmatmul.msk.bf16.vlgmr.msra.gmra.mxu0 %vm492_vm2, %v325_v22  ;;  %v5205_v22 = vld [vmem:[%s7729_s7 + $0x4f4] sm:$0xf0] }
  0xc0   :  { %3645 = vmatmul.msk.bf16.vlgmr.msra.gmra.mxu2 %vm608_vm3, %v5711_v31  ;;  %3648 = vmatmul.msk.bf16.vlgmr.msra.gmra.mxu1 %vm608_vm3, %v5711_v31  ;;  %v4278_v23 = vor.u32 %v5205_v22, %v4277_v21  ;;  %v3895_v21 = vld [vmem:[%s7729_s7 + $0x1f8] sm:$0xf0] }
  0xc1   :  { %689 = vmatpush.bf16.msra.mxu2 %v625_v32  ;;  %702 = vmatpush.bf16.msra.mxu3 %v628_v33  ;;  %v4018_v32 = vor.u32 %v5136_v29, %v4015_v30  ;;  %v3677_v33 = vld [vmem:[%s7729_s7 + $0x30] sm:$0xf]  ;;  %v5265_v29 = vld [vmem:[%s7729_s7 + $0x6d4] sm:$0xf0] }
  0xc2   :  { %2486 = vmatpush.bf16.msrb.mxu0 %v3726_v6  ;;  %v3678_v36 = vor.u32 %v5055_v34, %v3677_v33  ;;  %2499 = vmatpush.bf16.msrb.mxu1 %v3918_v53  ;;  %v5331_v33 = vld [vmem:[%s7729_s7 + $0x8e4] sm:$0xf0]  ;;  %v4469_v53 = vld [vmem:[%s7729_s7 + $0x660] sm:$0xf] }
  0xc6   :  { %2487 = vmatpush.bf16.msrb.mxu0 %v3702_v15  ;;  %2500 = vmatpush.bf16.msrb.mxu1 %v3894_v2  ;;  %v5313_v2 = vld [vmem:[%s7729_s7 + $0x854] sm:$0xf0] }
  0xca   :  { %2488 = vmatpush.bf16.msrb.mxu0 %v3678_v36  ;;  %v3823_v36 = vld [vmem:[%s7729_s7 + $0x168] sm:$0xf0] }
  0xcb   :  { %v3826_v37 = vor.u32 %v5088_v35, %v3823_v36  ;;  %v4613_v35 = vld [vmem:[%s7729_s7 + $0x780] sm:$0xf]  ;;  %v5289_v36 = vld [vmem:[%s7729_s7 + $0x794] sm:$0xf0] }
  0xcc   :  { %v4614_v39 = vor.u32 %v5289_v36, %v4613_v35  ;;  %v5232_v36 = vld [vmem:[%s7729_s7 + $0x5d4] sm:$0xf] }
  0xce   :  { %2489 = vmatpush.bf16.msrb.mxu0 %v3654_v48  ;;  %v3799_v48 = vld [vmem:[%s7729_s7 + $0x138] sm:$0xf0] }
  0xcf   :  { %3647 = vmatmul.msk.bf16.vlgmr.msrb.gmra.mxu3 %vm608_vm3, %v5711_v31  ;;  %v3802_v49 = vor.u32 %v5082_v47, %v3799_v48  ;;  %v5328_v48 = vld [vmem:[%s7729_s7 + $0x8d4] sm:$0xf] }
  0xd0   :  { %3646 = vmatmul.msk.bf16.vlgmr.msrb.gmra.mxu2 %vm608_vm3, %v5711_v31  ;;  %2521 = vmatpush.bf16.msrb.mxu3 %v4398_v55  ;;  %v5163_v55 = vld [vmem:[%s7729_s7 + $0x3a4] sm:$0xf0] }
  0xd1   :  { %2508 = vmatpush.bf16.msrb.mxu2 %v4206_v59  ;;  %v4110_v57 = vor.u32 %v5163_v55, %v4109_v54  ;;  %v4590_v59 = vor.u32 %v5283_v58, %v4589_v56  ;;  %v5253_v54 = vld [vmem:[%s7729_s7 + $0x674] sm:$0xf0]  ;;  %v4733_v56 = vld [vmem:[%s7729_s7 + $0x870] sm:$0xf]  ;;  %v5076_v58 = vld [vmem:[%s7729_s7 + $0xf4] sm:$0xf] }
  0xd2   :  { %v4470_v55 = vor.u32 %v5253_v54, %v4469_v53  ;;  %v3778_v61 = vor.u32 %v5076_v58, %v3775_v60  ;;  %v5322_v58 = vld [vmem:[%s7729_s7 + $0x8a4] sm:$0xf] }
  0xd3   :  { %2534 = vmatpush.bf16.msra.mxu0 %v4590_v59 }
  0xd4   :  { %2522 = vmatpush.bf16.msrb.mxu3 %v4374_v3  ;;  %v5157_v3 = vld [vmem:[%s7729_s7 + $0x374] sm:$0xf0] }
  0xd5   :  { %2509 = vmatpush.bf16.msrb.mxu2 %v4182_v7  ;;  %v4086_v6 = vor.u32 %v5157_v3, %v4085_v1  ;;  %v4566_v7 = vor.u32 %v5277_v5, %v4565_v4  ;;  %v4709_v1 = vld [vmem:[%s7729_s7 + $0x840] sm:$0xf]  ;;  %v5070_v4 = vld [vmem:[%s7729_s7 + $0xc4] sm:$0xf]  ;;  %v3751_v5 = vld [vmem:[%s7729_s7 + $0xd8] sm:$0xf0] }
  0xd6   :  { %v4710_v3 = vor.u32 %v5313_v2, %v4709_v1  ;;  %v5316_v2 = vld [vmem:[%s7729_s7 + $0x874] sm:$0xf] }
  0xd7   :  { %2535 = vmatpush.bf16.msra.mxu0 %v4566_v7 }
  0xd8   :  { %2523 = vmatpush.bf16.msrb.mxu3 %v4350_v12  ;;  %v5103_v12 = vld [vmem:[%s7729_s7 + $0x1c4] sm:$0xf0] }
  0xd9   :  { %2510 = vmatpush.bf16.msrb.mxu2 %v4158_v16  ;;  %v3870_v15 = vor.u32 %v5103_v12, %v3869_v10  ;;  %v4062_v16 = vor.u32 %v5151_v14, %v4061_v13  ;;  %v4685_v12 = vld [vmem:[%s7729_s7 + $0x810] sm:$0xf]  ;;  %v5307_v13 = vld [vmem:[%s7729_s7 + $0x824] sm:$0xf0] }
  0xda   :  { %v4686_v14 = vor.u32 %v5307_v13, %v4685_v12  ;;  %v5310_v13 = vld [vmem:[%s7729_s7 + $0x844] sm:$0xf] }
  0xdb   :  { %2501 = vmatpush.bf16.msrb.mxu1 %v3870_v15  ;;  %v5064_v15 = vld [vmem:[%s7729_s7 + $0x94] sm:$0xf] }
  0xdc   :  { %2524 = vmatpush.bf16.msrb.mxu3 %v4326_v17  ;;  %v4541_v17 = vld [vmem:[%s7729_s7 + $0x6f0] sm:$0xf] }
  0xdd   :  { %2511 = vmatpush.bf16.msrb.mxu2 %v4134_v44  ;;  %v4542_v19 = vor.u32 %v5271_v18, %v4541_v17  ;;  %v5325_v44 = vld [vmem:[%s7729_s7 + $0x8b4] sm:$0xf0]  ;;  %v4661_v18 = vld [vmem:[%s7729_s7 + $0x7e0] sm:$0xf] }
  0xde   :  { %v4758_v46 = vor.u32 %v5325_v44, %v4757_v43 }
  0xdf   :  { %3650 = vmatmul.msk.bf16.vlgmr.msra.gmra.mxu3 %vm608_vm3, %v5711_v31  ;;  %2536 = vmatpush.bf16.msra.mxu0 %v4542_v19  ;;  %v5301_v19 = vld [vmem:[%s7729_s7 + $0x7f4] sm:$0xf0] }
  0xe0   :  { %3649 = vmatmul.msk.bf16.vlgmr.msra.gmra.mxu2 %vm608_vm3, %v5711_v31  ;;  %2525 = vmatpush.bf16.msrb.mxu3 %v4302_v20  ;;  %v4230_v31 = vor.u32 %v5193_v28, %v4229_v27  ;;  %v5106_v20 = vld [vmem:[%s7729_s7 + $0x1e4] sm:$0xf]  ;;  %v5145_v27 = vld [vmem:[%s7729_s7 + $0x314] sm:$0xf0]  ;;  %v4517_v28 = vld [vmem:[%s7729_s7 + $0x6c0] sm:$0xf] }
  0xe1   :  { %2512 = vmatpush.bf16.msrb.mxu2 %v4110_v57  ;;  %v3898_v22 = vor.u32 %v5106_v20, %v3895_v21  ;;  %v4038_v30 = vor.u32 %v5145_v27, %v4037_v25  ;;  %v5319_v57 = vld [vmem:[%s7729_s7 + $0x884] sm:$0xf0]  ;;  %v5058_v20 = vld [vmem:[%s7729_s7 + $0x64] sm:$0xf] }
  0xe2   :  { %v4734_v59 = vor.u32 %v5319_v57, %v4733_v56 }
  0xe4   :  { %2526 = vmatpush.bf16.msrb.mxu3 %v4278_v23  ;;  %v3845_v23 = vld [vmem:[%s7729_s7 + $0x180] sm:$0xf] }
  0xe5   :  { %2513 = vmatpush.bf16.msrb.mxu2 %v4086_v6  ;;  %v3754_v6 = vor.u32 %v5070_v4, %v3751_v5 }
  0xe8   :  { %2527 = vmatpush.bf16.msrb.mxu3 %v4254_v26  ;;  %v3846_v26 = vor.u32 %v5097_v24, %v3845_v23  ;;  %v3703_v23 = vld [vmem:[%s7729_s7 + $0x78] sm:$0xf0] }
  0xe9   :  { %2514 = vmatpush.bf16.msrb.mxu2 %v4062_v16  ;;  %v3727_v16 = vld [vmem:[%s7729_s7 + $0xa8] sm:$0xf0]  ;;  %v3706_v25 = vor.u32 %v5058_v20, %v3703_v23 }
  0xea   :  { %2502 = vmatpush.bf16.msrb.mxu1 %v3846_v26  ;;  %v3730_v17 = vor.u32 %v5064_v15, %v3727_v16  ;;  %v5172_v16 = vld [vmem:[%s7729_s7 + $0x3f4] sm:$0xf]  ;;  %v4687_v20 = vld [vmem:[%s7729_s7 + $0x828] sm:$0xf0] }
  0xec   :  { %2528 = vmatpush.bf16.msrb.mxu3 %v4230_v31  ;;  %v4518_v31 = vor.u32 %v5265_v29, %v4517_v28  ;;  %v4637_v28 = vld [vmem:[%s7729_s7 + $0x7b0] sm:$0xf]  ;;  %v5295_v29 = vld [vmem:[%s7729_s7 + $0x7c4] sm:$0xf0] }
  0xed   :  { %2515 = vmatpush.bf16.msrb.mxu2 %v4038_v30  ;;  %v4638_v30 = vor.u32 %v5295_v29, %v4637_v28 }
  0xee   :  { %2537 = vmatpush.bf16.msra.mxu0 %v4518_v31  ;;  %v5052_v31 = vld [vmem:[%s7729_s7 + $0x34] sm:$0xf] }
  0xf0   :  { %2573 = vmatpush.bf16.msra.mxu3 %v4018_v32  ;;  %v4781_v32 = vld [vmem:[%s7729_s7 + $0x8d0] sm:$0xf] }
  0xf1   :  { %v4782_v34 = vor.u32 %v5331_v33, %v4781_v32  ;;  %2560 = vmatpush.bf16.msra.mxu2 %v3826_v37  ;;  %v3679_v32 = vld [vmem:[%s7729_s7 + $0x48] sm:$0xf0]  ;;  %v5046_v37 = vld [vmem:[%s7729_s7 + $0x4] sm:$0xf] }
  0xf2   :  { %v3682_v33 = vor.u32 %v5052_v31, %v3679_v32  ;;  %v5298_v31 = vld [vmem:[%s7729_s7 + $0x7e4] sm:$0xf]  ;;  %v4663_v32 = vld [vmem:[%s7729_s7 + $0x7f8] sm:$0xf0] }
  0xf3   :  { %2547 = vmatpush.bf16.msra.mxu1 %v4782_v34  ;;  %v6108_v34 = vld [vmem:[%s7730_s6] sm:$0x3f] }
  0xf4   :  { %2574 = vmatpush.bf16.msra.mxu3 %v3994_v40  ;;  %v4493_v40 = vld [vmem:[%s7729_s7 + $0x690] sm:$0xf]  ;;  %v713_v44 = vperm.slane %v6108_v34, 3  ;;  %v711_v23 = vperm.slane %v6108_v34, 1 }
  0xf5   :  { %v4494_v45 = vor.u32 %v5259_v42, %v4493_v40  ;;  %2561 = vmatpush.bf16.msra.mxu2 %v3802_v49  ;;  %v3655_v40 = vld [vmem:[%s7729_s7 + $0x18] sm:$0xf0]  ;;  %v4783_v49 = vld [vmem:[%s7729_s7 + $0x8e8] sm:$0xf0] }
  0xf6   :  { %v3658_v42 = vor.u32 %v5046_v37, %v3655_v40  ;;  %v4786_v54 = vor.u32 %v5328_v48, %v4783_v49  ;;  %v4666_v40 = vor.u32 %v5298_v31, %v4663_v32  ;;  %v4039_v31 = vld [vmem:[%s7729_s7 + $0x318] sm:$0xf0] }
  0xf7   :  { %2538 = vmatpush.bf16.msra.mxu0 %v4494_v45  ;;  %2548 = vmatpush.bf16.msra.mxu1 %v4758_v46 }
  0xf8   :  { %2575 = vmatpush.bf16.msra.mxu3 %v3970_v52  ;;  %v3850_v52 = vor.u32 %v5094_v50, %v3847_v51 }
  0xf9   :  { %2562 = vmatpush.bf16.msra.mxu2 %v3778_v61 }
  0xfb   :  { %2539 = vmatpush.bf16.msra.mxu0 %v4470_v55  ;;  %2549 = vmatpush.bf16.msra.mxu1 %v4734_v59  ;;  %v4759_v59 = vld [vmem:[%s7729_s7 + $0x8b8] sm:$0xf0] }
  0xfc   :  { %2576 = vmatpush.bf16.msra.mxu3 %v3946_v62  ;;  %v4445_v62 = vld [vmem:[%s7729_s7 + $0x630] sm:$0xf] }
  0xfd   :  { %v4446_v0 = vor.u32 %v5247_v63, %v4445_v62  ;;  %2563 = vmatpush.bf16.msra.mxu2 %v3754_v6  ;;  %v5184_v62 = vld [vmem:[%s7729_s7 + $0x454] sm:$0xf]  ;;  %v4207_v63 = vld [vmem:[%s7729_s7 + $0x468] sm:$0xf0] }
  0xfe   :  { %v4210_v4 = vor.u32 %v5184_v62, %v4207_v63  ;;  %v4087_v62 = vld [vmem:[%s7729_s7 + $0x378] sm:$0xf0]  ;;  %v5286_v63 = vld [vmem:[%s7729_s7 + $0x784] sm:$0xf] }
  0xff   :  { %2540 = vmatpush.bf16.msra.mxu0 %v4446_v0  ;;  %2550 = vmatpush.bf16.msra.mxu1 %v4710_v3  ;;  %v4762_v0 = vor.u32 %v5322_v58, %v4759_v59  ;;  %v4735_v3 = vld [vmem:[%s7729_s7 + $0x888] sm:$0xf0]  ;;  %v4567_v58 = vld [vmem:[%s7729_s7 + $0x738] sm:$0xf0] }
 0x100   :  { %2577 = vmatpush.bf16.msra.mxu3 %v3922_v11  ;;  %v4422_v11 = vor.u32 %v5241_v9, %v4421_v8  ;;  %v5178_v8 = vld [vmem:[%s7729_s7 + $0x424] sm:$0xf]  ;;  %v4183_v9 = vld [vmem:[%s7729_s7 + $0x438] sm:$0xf0]  ;;  %v4738_v12 = vor.u32 %v5316_v2, %v4735_v3  ;;  %v4405_v3 = vld [vmem:[%s7729_s7 + $0x5d8] sm:$0xf] }
 0x101   :  { %2564 = vmatpush.bf16.msra.mxu2 %v3730_v17  ;;  %v4186_v15 = vor.u32 %v5178_v8, %v4183_v9  ;;  %v4159_v17 = vld [vmem:[%s7729_s7 + $0x408] sm:$0xf0] }
 0x102   :  { %v4351_v9 = vld [vmem:[%s7729_s7 + $0x588] sm:$0xf0] }
 0x103   :  { %2541 = vmatpush.bf16.msra.mxu0 %v4422_v11  ;;  %2551 = vmatpush.bf16.msra.mxu1 %v4686_v14  ;;  %v4711_v14 = vld [vmem:[%s7729_s7 + $0x858] sm:$0xf0] }
 0x104   :  { %2578 = vmatpush.bf16.msra.mxu3 %v3898_v22  ;;  %v4662_v22 = vor.u32 %v5301_v19, %v4661_v18  ;;  %v4714_v18 = vor.u32 %v5310_v13, %v4711_v14  ;;  %v5304_v19 = vld [vmem:[%s7729_s7 + $0x814] sm:$0xf] }
 0x105   :  { %2565 = vmatpush.bf16.msra.mxu2 %v3706_v25  ;;  %v5166_v25 = vld [vmem:[%s7729_s7 + $0x3c4] sm:$0xf]  ;;  %v4690_v29 = vor.u32 %v5304_v19, %v4687_v20  ;;  %v5148_v14 = vld [vmem:[%s7729_s7 + $0x334] sm:$0xf] }
 0x107   :  { %2552 = vmatpush.bf16.msra.mxu1 %v4662_v22  ;;  %v4162_v22 = vor.u32 %v5172_v16, %v4159_v17  ;;  %v714_v16 = vperm.slane %v6108_v34, 4  ;;  %v715_v17 = vperm.slane %v6108_v34, 5 }
 0x108   :  { %2579 = vmatpush.bf16.msra.mxu3 %v3874_v41 }
 0x109   :  { %2566 = vmatpush.bf16.msra.mxu2 %v3682_v33 }
 0x10b   :  { %2553 = vmatpush.bf16.msra.mxu1 %v4638_v30 }
 0x10c   :  { %2580 = vmatpush.bf16.msra.mxu3 %v3850_v52  ;;  %v710_v52 = vperm.slane %v6108_v34, 0 }
 0x10d   :  { %2567 = vmatpush.bf16.msra.mxu2 %v3658_v42  ;;  %v4111_v42 = vld [vmem:[%s7729_s7 + $0x3a8] sm:$0xf0] }
 0x10f   :  { %2554 = vmatpush.bf16.msra.mxu1 %v4614_v39 }
 0x12c   :  { %v6059_v7 = vpop.f32.mrf.mxu0 }
 0x12d   :  { %v6067_v10 = vpop.f32.mrf.mxu1 }
 0x132   :  { %v524_v21 = vpop.f32.mrf.mxu3 }
 0x133   :  { %v563_v24 = vpop.f32.mrf.mxu2 }
 0x134   :  { %v539_v26 = vpop.f32.mrf.mxu0 }
 0x135   :  { %v552_v27 = vpop.f32.mrf.mxu1  ;;  %v4135_v26 = vld [vmem:[%s7729_s7 + $0x3d8] sm:$0xf0] }
 0x136   :  { %v4138_v35 = vor.u32 %v5166_v25, %v4135_v26  ;;  %v4327_v25 = vld [vmem:[%s7729_s7 + $0x558] sm:$0xf0]  ;;  %v5262_v26 = vld [vmem:[%s7729_s7 + $0x6c4] sm:$0xf] }
 0x13a   :  { %v526_v38 = vpop.f32.mrf.mxu3 }
 0x13b   :  { %v565_v41 = vpop.f32.mrf.mxu2  ;;  %v4591_v38 = vld [vmem:[%s7729_s7 + $0x768] sm:$0xf0] }
 0x13c   :  { %v6122_v43 = vpop.f32.mrf.mxu0  ;;  %v5160_v41 = vld [vmem:[%s7729_s7 + $0x394] sm:$0xf] }
 0x13d   :  { %v678_v45 = vpop.f32.mrf.mxu1 }
 0x13e   :  { %v679_v46 = vadd.f32 %v678_v45, %v563_v24  ;;  %v5292_v45 = vld [vmem:[%s7729_s7 + $0x7b4] sm:$0xf] }
 0x140   :  { %v725_v47 = vadd.f32 %v713_v44, %v679_v46  ;;  %v4639_v46 = vld [vmem:[%s7729_s7 + $0x7c8] sm:$0xf0] }
 0x142   :  { %v731_v50 = vmax.f32 %v725_v47, 0.0  ;;  %v6131_v51 = vpop.f32.mrf.mxu3 }
 0x143   :  { %v639_v53 = vpop.f32.mrf.mxu2 }
 0x144   :  { %v6134_v55 = vpack.c.bf16 %v731_v50, %v731_v50  ;;  %v640_v56 = vadd.f32 %v639_v53, %v524_v21  ;;  %v591_v57 = vpop.f32.mrf.mxu0  ;;  %v712_v21 = vperm.slane %v6108_v34, 2  ;;  %v5226_v50 = vld [vmem:[%s7729_s7 + $0x5a4] sm:$0xf] }
 0x145   :  { %v680_v60 = vpop.f32.mrf.mxu1  ;;  %v5274_v57 = vld [vmem:[%s7729_s7 + $0x724] sm:$0xf] }
 0x146   :  { %v722_v61 = vadd.f32 %v710_v52, %v640_v56  ;;  %2529 = vmatmul.bf16.vlgmr.msrb.gmra.mxu3 %v6134_v55  ;;  %v4375_v56 = vld [vmem:[%s7729_s7 + $0x5b8] sm:$0xf0]  ;;  %v4642_v60 = vor.u32 %v5292_v45, %v4639_v46  ;;  %v4570_v2 = vor.u32 %v5274_v57, %v4567_v58  ;;  %v3829_v46 = vld [vmem:[%s7729_s7 + $0x158] sm:$0xf]  ;;  %v5250_v58 = vld [vmem:[%s7729_s7 + $0x664] sm:$0xf] }
 0x147   :  { %2625 = vmatpush.bf16.msrb.mxu3 %v4786_v54  ;;  %v4114_v54 = vor.u32 %v5160_v41, %v4111_v42  ;;  %v5208_v41 = vld [vmem:[%s7729_s7 + $0x514] sm:$0xf]  ;;  %v4303_v42 = vld [vmem:[%s7729_s7 + $0x528] sm:$0xf0] }
 0x148   :  { %v728_v1 = vmax.f32 %v722_v61, 0.0  ;;  %v5154_v61 = vld [vmem:[%s7729_s7 + $0x364] sm:$0xf]  ;;  %v4306_v57 = vor.u32 %v5208_v41, %v4303_v42  ;;  %v5068_v42 = vld [vmem:[%s7729_s7 + $0xac] sm:$0xf0] }
 0x149   :  { %v4090_v8 = vor.u32 %v5154_v61, %v4087_v62  ;;  %v5202_v62 = vld [vmem:[%s7729_s7 + $0x4e4] sm:$0xf] }
 0x14a   :  { %v6155_v5 = vpack.c.bf16 %v728_v1, %v728_v1  ;;  %v578_v6 = vpop.f32.mrf.mxu3  ;;  %v4378_v1 = vor.u32 %v5226_v50, %v4375_v56 }
 0x14b   :  { %2626 = vmatpush.bf16.msrb.mxu3 %v4762_v0  ;;  %v641_v11 = vpop.f32.mrf.mxu2  ;;  %v4615_v0 = vld [vmem:[%s7729_s7 + $0x798] sm:$0xf0]  ;;  %v5220_v6 = vld [vmem:[%s7729_s7 + $0x574] sm:$0xf] }
 0x14c   :  { %2490 = vmatmul.bf16.vlgmr.msrb.gmra.mxu0 %v6155_v5  ;;  %v5268_v11 = vld [vmem:[%s7729_s7 + $0x6f4] sm:$0xf]  ;;  %v4618_v13 = vor.u32 %v5286_v63, %v4615_v0  ;;  %v4354_v19 = vor.u32 %v5220_v6, %v4351_v9  ;;  %v4279_v63 = vld [vmem:[%s7729_s7 + $0x4f8] sm:$0xf0]  ;;  %v4309_v6 = vld [vmem:[%s7729_s7 + $0x518] sm:$0xf] }
 0x14d   :  { %2586 = vmatpush.bf16.msrb.mxu0 %v4210_v4  ;;  %v5236_v4 = vld [vmem:[%s7729_s7 + $0x5ec] sm:$0xf0]  ;;  %v4282_v9 = vor.u32 %v5202_v62, %v4279_v63  ;;  %v5062_v63 = vld [vmem:[%s7729_s7 + $0x7c] sm:$0xf0] }
 0x14f   :  { %2627 = vmatpush.bf16.msrb.mxu3 %v4738_v12  ;;  %v4543_v12 = vld [vmem:[%s7729_s7 + $0x708] sm:$0xf0] }
 0x150   :  { %v4546_v20 = vor.u32 %v5268_v11, %v4543_v12  ;;  %v5244_v11 = vld [vmem:[%s7729_s7 + $0x634] sm:$0xf]  ;;  %v4447_v12 = vld [vmem:[%s7729_s7 + $0x648] sm:$0xf0] }
 0x151   :  { %2587 = vmatpush.bf16.msrb.mxu0 %v4186_v15  ;;  %v4063_v15 = vld [vmem:[%s7729_s7 + $0x348] sm:$0xf0] }
 0x152   :  { %v665_v24 = vpop.f32.mrf.mxu3  ;;  %v4066_v34 = vor.u32 %v5148_v14, %v4063_v15  ;;  %v5196_v14 = vld [vmem:[%s7729_s7 + $0x4b4] sm:$0xf]  ;;  %v4255_v15 = vld [vmem:[%s7729_s7 + $0x4c8] sm:$0xf0] }
 0x153   :  { %2628 = vmatpush.bf16.msrb.mxu3 %v4714_v18  ;;  %v652_v27 = vpop.f32.mrf.mxu2  ;;  %v666_v28 = vadd.f32 %v665_v24, %v6067_v10  ;;  %v5280_v10 = vld [vmem:[%s7729_s7 + $0x754] sm:$0xf]  ;;  %v4406_v18 = vor.u32 %v5236_v4, %v4405_v3  ;;  %v5086_v3 = vld [vmem:[%s7729_s7 + $0x13c] sm:$0xf0] }
 0x154   :  { %v653_v30 = vadd.f32 %v652_v27, %v6059_v7  ;;  %v4399_v7 = vld [vmem:[%s7729_s7 + $0x5e8] sm:$0xf0]  ;;  %v4594_v49 = vor.u32 %v5280_v10, %v4591_v38  ;;  %v4519_v27 = vld [vmem:[%s7729_s7 + $0x6d8] sm:$0xf0] }
 0x155   :  { %v724_v33 = vadd.f32 %v712_v21, %v666_v28  ;;  %2588 = vmatpush.bf16.msrb.mxu0 %v4162_v22  ;;  %v4402_v48 = vor.u32 %v5232_v36, %v4399_v7  ;;  %v4381_v21 = vld [vmem:[%s7729_s7 + $0x5a8] sm:$0xf]  ;;  %v5230_v22 = vld [vmem:[%s7729_s7 + $0x5bc] sm:$0xf0]  ;;  %v5224_v7 = vld [vmem:[%s7729_s7 + $0x58c] sm:$0xf0] }
 0x156   :  { %v723_v37 = vadd.f32 %v711_v23, %v653_v30  ;;  %v5214_v23 = vld [vmem:[%s7729_s7 + $0x544] sm:$0xf] }
 0x157   :  { %v730_v39 = vmax.f32 %v724_v33, 0.0  ;;  %2629 = vmatpush.bf16.msrb.mxu3 %v4690_v29  ;;  %v5142_v30 = vld [vmem:[%s7729_s7 + $0x304] sm:$0xf]  ;;  %v4382_v33 = vor.u32 %v5230_v22, %v4381_v21  ;;  %v4330_v36 = vor.u32 %v5214_v23, %v4327_v25  ;;  %v5206_v21 = vld [vmem:[%s7729_s7 + $0x4fc] sm:$0xf0]  ;;  %v4258_v23 = vor.u32 %v5196_v14, %v4255_v15 }
 0x158   :  { %v729_v44 = vmax.f32 %v723_v37, 0.0  ;;  %v4522_v37 = vor.u32 %v5262_v26, %v4519_v27  ;;  %v4042_v38 = vor.u32 %v5142_v30, %v4039_v31  ;;  %v5190_v22 = vld [vmem:[%s7729_s7 + $0x484] sm:$0xf]  ;;  %v4423_v25 = vld [vmem:[%s7729_s7 + $0x618] sm:$0xf0] }
 0x159   :  { %v6222_v47 = vpack.c.bf16 %v730_v39, %v730_v39  ;;  %2589 = vmatpush.bf16.msrb.mxu0 %v4138_v35  ;;  %v4495_v39 = vld [vmem:[%s7729_s7 + $0x6a8] sm:$0xf0]  ;;  %v3757_v27 = vld [vmem:[%s7729_s7 + $0xc8] sm:$0xf]  ;;  %v5074_v31 = vld [vmem:[%s7729_s7 + $0xdc] sm:$0xf0] }
 0x15a   :  { %v6227_v52 = vpack.c.bf16 %v729_v44, %v729_v44  ;;  %v667_v53 = vpop.f32.mrf.mxu3  ;;  %v5056_v14 = vld [vmem:[%s7729_s7 + $0x4c] sm:$0xf0]  ;;  %v3949_v15 = vld [vmem:[%s7729_s7 + $0x248] sm:$0xf] }
 0x15b   :  { %2630 = vmatpush.bf16.msrb.mxu3 %v4666_v40  ;;  %v654_v59 = vpop.f32.mrf.mxu2  ;;  %2516 = vmatmul.bf16.vlgmr.msrb.gmra.mxu2 %v6222_v47  ;;  %v4333_v53 = vld [vmem:[%s7729_s7 + $0x548] sm:$0xf] }
 0x15c   :  { %2503 = vmatmul.bf16.vlgmr.msrb.gmra.mxu1 %v6227_v52  ;;  %2581 = vmatmul.bf16.vlgmr.msra.gmra.mxu3 %v6227_v52  ;;  %v4471_v59 = vld [vmem:[%s7729_s7 + $0x678] sm:$0xf0] }
 0x15d   :  { %2599 = vmatpush.bf16.msrb.mxu1 %v4402_v48  ;;  %2612 = vmatpush.bf16.msrb.mxu2 %v4594_v49  ;;  %v5092_v48 = vld [vmem:[%s7729_s7 + $0x16c] sm:$0xf0]  ;;  %v4474_v4 = vor.u32 %v5250_v58, %v4471_v59  ;;  %v3709_v59 = vld [vmem:[%s7729_s7 + $0x68] sm:$0xf] }
 0x15e   :  { %2590 = vmatpush.bf16.msrb.mxu0 %v4114_v54  ;;  %v5218_v54 = vld [vmem:[%s7729_s7 + $0x55c] sm:$0xf0]  ;;  %v3830_v61 = vor.u32 %v5092_v48, %v3829_v46  ;;  %v4237_v46 = vld [vmem:[%s7729_s7 + $0x488] sm:$0xf] }
 0x15f   :  { %2631 = vmatpush.bf16.msrb.mxu3 %v4642_v60  ;;  %v5194_v48 = vld [vmem:[%s7729_s7 + $0x49c] sm:$0xf0] }
 0x160   :  { %v4238_v62 = vor.u32 %v5194_v48, %v4237_v46  ;;  %v4069_v46 = vld [vmem:[%s7729_s7 + $0x338] sm:$0xf]  ;;  %v5152_v48 = vld [vmem:[%s7729_s7 + $0x34c] sm:$0xf0] }
 0x161   :  { %2600 = vmatpush.bf16.msrb.mxu1 %v4378_v1  ;;  %2613 = vmatpush.bf16.msrb.mxu2 %v4570_v2  ;;  %v4334_v1 = vor.u32 %v5218_v54, %v4333_v53  ;;  %v3805_v2 = vld [vmem:[%s7729_s7 + $0x128] sm:$0xf]  ;;  %v5137_v53 = vld [vmem:[%s7729_s7 + $0x2dc] sm:$0xf]  ;;  %v4023_v54 = vld [vmem:[%s7729_s7 + $0x2f0] sm:$0xf0] }
 0x162   :  { %v704_v24 = vpop.f32.mrf.mxu3  ;;  %2591 = vmatpush.bf16.msrb.mxu0 %v4090_v8  ;;  %v5212_v8 = vld [vmem:[%s7729_s7 + $0x52c] sm:$0xf0] }
 0x163   :  { %2632 = vmatpush.bf16.msrb.mxu3 %v4618_v13  ;;  %v691_v28 = vpop.f32.mrf.mxu2  ;;  %v705_v29 = vadd.f32 %v704_v24, %v6122_v43  ;;  %v4357_v43 = vld [vmem:[%s7729_s7 + $0x578] sm:$0xf]  ;;  %v3806_v13 = vor.u32 %v5086_v3, %v3805_v2  ;;  %v4231_v24 = vld [vmem:[%s7729_s7 + $0x498] sm:$0xf0]  ;;  %v4026_v2 = vor.u32 %v5137_v53, %v4023_v54  ;;  %v5104_v54 = vld [vmem:[%s7729_s7 + $0x1cc] sm:$0xf0] }
 0x164   :  { %v692_v32 = vadd.f32 %v691_v28, %v6131_v51  ;;  %v5256_v51 = vld [vmem:[%s7729_s7 + $0x694] sm:$0xf]  ;;  %v4358_v45 = vor.u32 %v5224_v7, %v4357_v43  ;;  %v4213_v28 = vld [vmem:[%s7729_s7 + $0x458] sm:$0xf]  ;;  %v4234_v43 = vor.u32 %v5190_v22, %v4231_v24 }
 0x165   :  { %v727_v35 = vadd.f32 %v715_v17, %v705_v29  ;;  %2601 = vmatpush.bf16.msrb.mxu1 %v4354_v19  ;;  %2614 = vmatpush.bf16.msrb.mxu2 %v4546_v20  ;;  %v4498_v50 = vor.u32 %v5256_v51, %v4495_v39  ;;  %v3781_v17 = vld [vmem:[%s7729_s7 + $0xf8] sm:$0xf]  ;;  %v4450_v19 = vor.u32 %v5244_v11, %v4447_v12  ;;  %v4285_v20 = vld [vmem:[%s7729_s7 + $0x4e8] sm:$0xf]  ;;  %v5188_v29 = vld [vmem:[%s7729_s7 + $0x46c] sm:$0xf0] }
 0x166   :  { %v726_v10 = vadd.f32 %v714_v16, %v692_v32  ;;  %2592 = vmatpush.bf16.msrb.mxu0 %v4066_v34  ;;  %v4310_v16 = vor.u32 %v5212_v8, %v4309_v6  ;;  %v5238_v34 = vld [vmem:[%s7729_s7 + $0x604] sm:$0xf]  ;;  %v4286_v30 = vor.u32 %v5206_v21, %v4285_v20  ;;  %v4021_v32 = vld [vmem:[%s7729_s7 + $0x2d8] sm:$0xf]  ;;  %v4214_v7 = vor.u32 %v5188_v29, %v4213_v28  ;;  %v4189_v39 = vld [vmem:[%s7729_s7 + $0x428] sm:$0xf] }
 0x167   :  { %2677 = vmatpush.bf16.msra.mxu3 %v4406_v18  ;;  %v733_v40 = vmax.f32 %v727_v35, 0.0  ;;  %v5080_v18 = vld [vmem:[%s7729_s7 + $0x10c] sm:$0xf0]  ;;  %v4426_v35 = vor.u32 %v5238_v34, %v4423_v25  ;;  %v3733_v51 = vld [vmem:[%s7729_s7 + $0x98] sm:$0xf]  ;;  %v3710_v8 = vor.u32 %v5062_v63, %v3709_v59 }
 0x168   :  { %v732_v44 = vmax.f32 %v726_v10, 0.0  ;;  %v3782_v26 = vor.u32 %v5080_v18, %v3781_v17  ;;  %v3758_v10 = vor.u32 %v5074_v31, %v3757_v27  ;;  %v3999_v6 = vld [vmem:[%s7729_s7 + $0x2c0] sm:$0xf0]  ;;  %v3685_v11 = vld [vmem:[%s7729_s7 + $0x38] sm:$0xf] }
 0x169   :  { %v6329_v49 = vpack.c.bf16 %v733_v40, %v733_v40  ;;  %2602 = vmatpush.bf16.msrb.mxu1 %v4330_v36  ;;  %2615 = vmatpush.bf16.msrb.mxu2 %v4522_v37  ;;  %v4261_v36 = vld [vmem:[%s7729_s7 + $0x4b8] sm:$0xf]  ;;  %v5200_v37 = vld [vmem:[%s7729_s7 + $0x4cc] sm:$0xf0]  ;;  %v5182_v40 = vld [vmem:[%s7729_s7 + $0x43c] sm:$0xf0]  ;;  %v3686_v21 = vor.u32 %v5056_v14, %v3685_v11 }
 0x16a   :  { %v6337_v56 = vpack.c.bf16 %v732_v44, %v732_v44  ;;  %2593 = vmatpush.bf16.msrb.mxu0 %v4042_v38  ;;  %v706_v60 = vpop.f32.mrf.mxu3  ;;  %v4262_v41 = vor.u32 %v5200_v37, %v4261_v36  ;;  %v3997_v44 = vld [vmem:[%s7729_s7 + $0x2a8] sm:$0xf]  ;;  %v3975_v20 = vld [vmem:[%s7729_s7 + $0x290] sm:$0xf0]  ;;  %v4117_v24 = vld [vmem:[%s7729_s7 + $0x398] sm:$0xf] }
 0x16b   :  { %2678 = vmatpush.bf16.msra.mxu3 %v4382_v33  ;;  %2568 = vmatmul.bf16.vlgmr.msra.gmra.mxu2 %v6155_v5  ;;  %v693_v0 = vpop.f32.mrf.mxu2  ;;  %v5140_v33 = vld [vmem:[%s7729_s7 + $0x2ec] sm:$0xf0]  ;;  %v4165_v60 = vld [vmem:[%s7729_s7 + $0x3f8] sm:$0xf]  ;;  %v4141_v12 = vld [vmem:[%s7729_s7 + $0x3c8] sm:$0xf] }
 0x16c   :  { %2542 = vmatmul.bf16.vlgmr.msra.gmra.mxu0 %v6337_v56  ;;  %2555 = vmatmul.bf16.vlgmr.msra.gmra.mxu1 %v6329_v49  ;;  %v4022_v38 = vor.u32 %v5140_v33, %v4021_v32  ;;  %v3973_v0 = vld [vmem:[%s7729_s7 + $0x278] sm:$0xf]  ;;  %v5164_v34 = vld [vmem:[%s7729_s7 + $0x3ac] sm:$0xf0]  ;;  %v5050_v25 = vld [vmem:[%s7729_s7 + $0x1c] sm:$0xf0] }
 0x16d   :  { %2616 = vmatpush.bf16.msrb.mxu2 %v4498_v50  ;;  %2603 = vmatpush.bf16.msrb.mxu1 %v4306_v57  ;;  %v4190_v50 = vor.u32 %v5182_v40, %v4189_v39  ;;  %v3734_v57 = vor.u32 %v5068_v42, %v3733_v51  ;;  %v5116_v27 = vld [vmem:[%s7729_s7 + $0x22c] sm:$0xf0]  ;;  %v4597_v29 = vld [vmem:[%s7729_s7 + $0x758] sm:$0xf]  ;;  %v4118_v31 = vor.u32 %v5164_v34, %v4117_v24  ;;  %v5119_v32 = vld [vmem:[%s7729_s7 + $0x24c] sm:$0xf] }
 0x16e   :  { %2633 = vmatmul.bf16.vlgmr.msrb.gmra.mxu3 %v6329_v49  ;;  %2638 = vmatpush.bf16.msra.mxu0 %v3830_v61  ;;  %v5176_v61 = vld [vmem:[%s7729_s7 + $0x40c] sm:$0xf0]  ;;  %v3951_v33 = vld [vmem:[%s7729_s7 + $0x260] sm:$0xf0]  ;;  %v4093_v37 = vld [vmem:[%s7729_s7 + $0x368] sm:$0xf] }
 0x16f   :  { %2679 = vmatpush.bf16.msra.mxu3 %v4358_v45  ;;  %v5134_v45 = vld [vmem:[%s7729_s7 + $0x2bc] sm:$0xf0]  ;;  %v4166_v3 = vor.u32 %v5176_v61, %v4165_v60  ;;  %v3954_v51 = vor.u32 %v5119_v32, %v3951_v33  ;;  %v4573_v39 = vld [vmem:[%s7729_s7 + $0x728] sm:$0xf]  ;;  %v5113_v42 = vld [vmem:[%s7729_s7 + $0x21c] sm:$0xf]  ;;  %v4070_v60 = vor.u32 %v5152_v48, %v4069_v46 }
 0x170   :  { %v3998_v58 = vor.u32 %v5134_v45, %v3997_v44  ;;  %v5278_v40 = vld [vmem:[%s7729_s7 + $0x73c] sm:$0xf0]  ;;  %v3927_v44 = vld [vmem:[%s7729_s7 + $0x230] sm:$0xf0]  ;;  %v3877_v53 = vld [vmem:[%s7729_s7 + $0x1b8] sm:$0xf] }
 0x171   :  { %2617 = vmatpush.bf16.msrb.mxu2 %v4474_v4  ;;  %2604 = vmatpush.bf16.msrb.mxu1 %v4282_v9  ;;  %v5131_v4 = vld [vmem:[%s7729_s7 + $0x2ac] sm:$0xf]  ;;  %v5272_v59 = vld [vmem:[%s7729_s7 + $0x70c] sm:$0xf0]  ;;  %v3853_v63 = vld [vmem:[%s7729_s7 + $0x188] sm:$0xf] }
 0x172   :  { %2639 = vmatpush.bf16.msra.mxu0 %v3806_v13  ;;  %v5170_v13 = vld [vmem:[%s7729_s7 + $0x3dc] sm:$0xf0]  ;;  %v4002_v17 = vor.u32 %v5131_v4, %v3999_v6  ;;  %v5107_v61 = vld [vmem:[%s7729_s7 + $0x1ec] sm:$0xf]  ;;  %v4525_v6 = vld [vmem:[%s7729_s7 + $0x6c8] sm:$0xf] }
 0x173   :  { %2680 = vmatpush.bf16.msra.mxu3 %v4334_v1  ;;  %v5128_v1 = vld [vmem:[%s7729_s7 + $0x28c] sm:$0xf0]  ;;  %v4142_v18 = vor.u32 %v5170_v13, %v4141_v12  ;;  %v5266_v12 = vld [vmem:[%s7729_s7 + $0x6dc] sm:$0xf0]  ;;  %v4789_v13 = vld [vmem:[%s7729_s7 + $0x8d8] sm:$0xf] }
 0x174   :  { %v3974_v9 = vor.u32 %v5128_v1, %v3973_v0  ;;  %v3878_v0 = vor.u32 %v5104_v54, %v3877_v53  ;;  %v5098_v1 = vld [vmem:[%s7729_s7 + $0x19c] sm:$0xf0]  ;;  %v5332_v14 = vld [vmem:[%s7729_s7 + $0x8ec] sm:$0xf0]  ;;  %v3807_v24 = vld [vmem:[%s7729_s7 + $0x140] sm:$0xf0] }
 0x175   :  { %2618 = vmatpush.bf16.msrb.mxu2 %v4450_v19  ;;  %2605 = vmatpush.bf16.msrb.mxu1 %v4258_v23  ;;  %v5125_v19 = vld [vmem:[%s7729_s7 + $0x27c] sm:$0xf]  ;;  %v3661_v23 = vld [vmem:[%s7729_s7 + $0x8] sm:$0xf]  ;;  %v4791_v32 = vld [vmem:[%s7729_s7 + $0x8f0] sm:$0xf0] }
 0x176   :  { %2640 = vmatpush.bf16.msra.mxu0 %v3782_v26  ;;  %v3925_v26 = vld [vmem:[%s7729_s7 + $0x218] sm:$0xf]  ;;  %v3978_v28 = vor.u32 %v5125_v19, %v3975_v20  ;;  %v4526_v20 = vor.u32 %v5266_v12, %v4525_v6  ;;  %v5071_v48 = vld [vmem:[%s7729_s7 + $0xcc] sm:$0xf]  ;;  %v5248_v53 = vld [vmem:[%s7729_s7 + $0x64c] sm:$0xf0] }
 0x177   :  { %2681 = vmatpush.bf16.msra.mxu3 %v4310_v16  ;;  %v5122_v16 = vld [vmem:[%s7729_s7 + $0x25c] sm:$0xf0]  ;;  %v3926_v36 = vor.u32 %v5116_v27, %v3925_v26  ;;  %v4765_v26 = vld [vmem:[%s7729_s7 + $0x8a8] sm:$0xf]  ;;  %v4453_v46 = vld [vmem:[%s7729_s7 + $0x638] sm:$0xf] }
 0x178   :  { %v3950_v22 = vor.u32 %v5122_v16, %v3949_v15  ;;  %v5101_v16 = vld [vmem:[%s7729_s7 + $0x1bc] sm:$0xf]  ;;  %v5326_v27 = vld [vmem:[%s7729_s7 + $0x8bc] sm:$0xf0]  ;;  %v4717_v54 = vld [vmem:[%s7729_s7 + $0x848] sm:$0xf] }
 0x179   :  { %2619 = vmatpush.bf16.msrb.mxu2 %v4426_v35  ;;  %2606 = vmatpush.bf16.msrb.mxu1 %v4234_v43  ;;  %v3662_v35 = vor.u32 %v5050_v25, %v3661_v23  ;;  %v5158_v43 = vld [vmem:[%s7729_s7 + $0x37c] sm:$0xf0]  ;;  %v5083_v23 = vld [vmem:[%s7729_s7 + $0x12c] sm:$0xf]  ;;  %v5260_v25 = vld [vmem:[%s7729_s7 + $0x6ac] sm:$0xf0] }
 0x17a   :  { %2641 = vmatpush.bf16.msra.mxu0 %v3758_v10  ;;  %v3901_v10 = vld [vmem:[%s7729_s7 + $0x1e8] sm:$0xf]  ;;  %v5308_v6 = vld [vmem:[%s7729_s7 + $0x82c] sm:$0xf0] }
 0x17b   :  { %2682 = vmatpush.bf16.msra.mxu3 %v4286_v30  ;;  %v5284_v30 = vld [vmem:[%s7729_s7 + $0x76c] sm:$0xf0] }
 0x17c   :  { %2594 = vmatmul.bf16.vlgmr.msrb.gmra.mxu0 %v6222_v47  ;;  %2607 = vmatmul.bf16.vlgmr.msrb.gmra.mxu1 %v6134_v55 }
 0x17d   :  { %2664 = vmatpush.bf16.msra.mxu2 %v4214_v7  ;;  %2651 = vmatpush.bf16.msra.mxu1 %v4022_v38  ;;  %v4598_v7 = vor.u32 %v5284_v30, %v4597_v29  ;;  %v5110_v38 = vld [vmem:[%s7729_s7 + $0x1fc] sm:$0xf0]  ;;  %v3855_v29 = vld [vmem:[%s7729_s7 + $0x1a0] sm:$0xf0]  ;;  %v3810_v30 = vor.u32 %v5083_v23, %v3807_v24  ;;  %v5179_v23 = vld [vmem:[%s7729_s7 + $0x42c] sm:$0xf] }
 0x17e   :  { %2620 = vmatmul.bf16.vlgmr.msrb.gmra.mxu2 %v6337_v56  ;;  %2642 = vmatpush.bf16.msra.mxu0 %v3734_v57  ;;  %v3902_v45 = vor.u32 %v5110_v38, %v3901_v10  ;;  %v3930_v57 = vor.u32 %v5113_v42, %v3927_v44  ;;  %v5254_v10 = vld [vmem:[%s7729_s7 + $0x67c] sm:$0xf0]  ;;  %v4741_v38 = vld [vmem:[%s7729_s7 + $0x878] sm:$0xf]  ;;  %v4767_v42 = vld [vmem:[%s7729_s7 + $0x8c0] sm:$0xf0] }
 0x17f   :  { %2683 = vmatpush.bf16.msra.mxu3 %v4262_v41  ;;  %v4094_v41 = vor.u32 %v5158_v43, %v4093_v37  ;;  %v5077_v37 = vld [vmem:[%s7729_s7 + $0xfc] sm:$0xf]  ;;  %v3783_v43 = vld [vmem:[%s7729_s7 + $0x110] sm:$0xf0]  ;;  %v4191_v24 = vld [vmem:[%s7729_s7 + $0x440] sm:$0xf0] }
 0x181   :  { %2665 = vmatpush.bf16.msra.mxu2 %v4190_v50  ;;  %2652 = vmatpush.bf16.msra.mxu1 %v3998_v58  ;;  %v4574_v50 = vor.u32 %v5278_v40, %v4573_v39  ;;  %v4549_v58 = vld [vmem:[%s7729_s7 + $0x6f8] sm:$0xf]  ;;  %v3786_v40 = vor.u32 %v5077_v37, %v3783_v43  ;;  %v5299_v43 = vld [vmem:[%s7729_s7 + $0x7ec] sm:$0xf] }
 0x182   :  { %2643 = vmatpush.bf16.msra.mxu0 %v3710_v8  ;;  %v4550_v4 = vor.u32 %v5272_v59, %v4549_v58  ;;  %v5089_v8 = vld [vmem:[%s7729_s7 + $0x15c] sm:$0xf] }
 0x183   :  { %2684 = vmatpush.bf16.msra.mxu3 %v4238_v62  ;;  %v3903_v62 = vld [vmem:[%s7729_s7 + $0x200] sm:$0xf0] }
 0x184   :  { %v3906_v11 = vor.u32 %v5107_v61, %v3903_v62  ;;  %v4743_v61 = vld [vmem:[%s7729_s7 + $0x890] sm:$0xf0]  ;;  %v4454_v62 = vor.u32 %v5248_v53, %v4453_v46 }
 0x185   :  { %2666 = vmatpush.bf16.msra.mxu2 %v4166_v3  ;;  %2653 = vmatpush.bf16.msra.mxu1 %v3974_v9  ;;  %v5146_v3 = vld [vmem:[%s7729_s7 + $0x31c] sm:$0xf0]  ;;  %v3831_v9 = vld [vmem:[%s7729_s7 + $0x170] sm:$0xf0] }
 0x186   :  { %2685 = vmatmul.bf16.vlgmr.msra.gmra.mxu3 %v6134_v55  ;;  %2644 = vmatpush.bf16.msra.mxu0 %v3686_v21  ;;  %v3834_v19 = vor.u32 %v5089_v8, %v3831_v9  ;;  %v4790_v21 = vor.u32 %v5332_v14, %v4789_v13  ;;  %v5185_v9 = vld [vmem:[%s7729_s7 + $0x45c] sm:$0xf]  ;;  %v5311_v13 = vld [vmem:[%s7729_s7 + $0x84c] sm:$0xf]  ;;  %v4719_v14 = vld [vmem:[%s7729_s7 + $0x860] sm:$0xf0] }
 0x187   :  { %2729 = vmatpush.bf16.msrb.mxu3 %v4026_v2  ;;  %v4045_v2 = vld [vmem:[%s7729_s7 + $0x308] sm:$0xf]  ;;  %v4407_v53 = vld [vmem:[%s7729_s7 + $0x5f0] sm:$0xf0] }
 0x188   :  { %v4046_v15 = vor.u32 %v5146_v3, %v4045_v2  ;;  %v3735_v2 = vld [vmem:[%s7729_s7 + $0xb0] sm:$0xf0]  ;;  %v5242_v3 = vld [vmem:[%s7729_s7 + $0x61c] sm:$0xf0] }
 0x189   :  { %2667 = vmatpush.bf16.msra.mxu2 %v4142_v18  ;;  %2654 = vmatpush.bf16.msra.mxu1 %v3950_v22  ;;  %v3854_v18 = vor.u32 %v5098_v1, %v3853_v63  ;;  %v4501_v22 = vld [vmem:[%s7729_s7 + $0x698] sm:$0xf]  ;;  %v5065_v1 = vld [vmem:[%s7729_s7 + $0x9c] sm:$0xf] }
 0x18a   :  { %2645 = vmatpush.bf16.msra.mxu0 %v3662_v35  ;;  %v4502_v33 = vor.u32 %v5260_v25, %v4501_v22  ;;  %v4766_v35 = vor.u32 %v5326_v27, %v4765_v26  ;;  %v3738_v12 = vor.u32 %v5065_v1, %v3735_v2  ;;  %v4722_v22 = vor.u32 %v5311_v13, %v4719_v14  ;;  %v5305_v25 = vld [vmem:[%s7729_s7 + $0x81c] sm:$0xf]  ;;  %v4695_v26 = vld [vmem:[%s7729_s7 + $0x830] sm:$0xf0]  ;;  %v4575_v1 = vld [vmem:[%s7729_s7 + $0x740] sm:$0xf0] }
 0x18b   :  { %2730 = vmatpush.bf16.msrb.mxu3 %v4002_v17  ;;  %v3879_v17 = vld [vmem:[%s7729_s7 + $0x1d0] sm:$0xf0]  ;;  %v5237_v13 = vld [vmem:[%s7729_s7 + $0x5f4] sm:$0xf0] }
 0x18c   :  { %v3882_v34 = vor.u32 %v5101_v16, %v3879_v17  ;;  %v5059_v17 = vld [vmem:[%s7729_s7 + $0x6c] sm:$0xf] }
 0x18d   :  { %2668 = vmatpush.bf16.msra.mxu2 %v4118_v31  ;;  %2655 = vmatpush.bf16.msra.mxu1 %v3926_v36  ;;  %v5329_v31 = vld [vmem:[%s7729_s7 + $0x8dc] sm:$0xf]  ;;  %v4477_v36 = vld [vmem:[%s7729_s7 + $0x668] sm:$0xf] }
 0x18e   :  { %2690 = vmatpush.bf16.msrb.mxu0 %v4598_v7  ;;  %v4794_v39 = vor.u32 %v5329_v31, %v4791_v32  ;;  %v4478_v44 = vor.u32 %v5254_v10, %v4477_v36  ;;  %v4645_v31 = vld [vmem:[%s7729_s7 + $0x7b8] sm:$0xf]  ;;  %v5296_v32 = vld [vmem:[%s7729_s7 + $0x7cc] sm:$0xf0]  ;;  %v4167_v36 = vld [vmem:[%s7729_s7 + $0x410] sm:$0xf0] }
 0x18f   :  { %2731 = vmatpush.bf16.msrb.mxu3 %v3978_v28  ;;  %2646 = vmatmul.bf16.vlgmr.msra.gmra.mxu0 %v6155_v5  ;;  %v5095_v28 = vld [vmem:[%s7729_s7 + $0x18c] sm:$0xf]  ;;  %v4621_v10 = vld [vmem:[%s7729_s7 + $0x788] sm:$0xf] }
 0x190   :  { %v3858_v7 = vor.u32 %v5095_v28, %v3855_v29  ;;  %v5053_v28 = vld [vmem:[%s7729_s7 + $0x3c] sm:$0xf]  ;;  %v3687_v29 = vld [vmem:[%s7729_s7 + $0x50] sm:$0xf0] }
 0x191   :  { %2669 = vmatpush.bf16.msra.mxu2 %v4094_v41  ;;  %2656 = vmatpush.bf16.msra.mxu1 %v3902_v45  ;;  %v5323_v41 = vld [vmem:[%s7729_s7 + $0x8ac] sm:$0xf]  ;;  %v3690_v37 = vor.u32 %v5053_v28, %v3687_v29  ;;  %v5149_v28 = vld [vmem:[%s7729_s7 + $0x33c] sm:$0xf] }
 0x192   :  { %2691 = vmatpush.bf16.msrb.mxu0 %v4574_v50  ;;  %v3759_v50 = vld [vmem:[%s7729_s7 + $0xe0] sm:$0xf0]  ;;  %v4770_v58 = vor.u32 %v5323_v41, %v4767_v42  ;;  %v5167_v42 = vld [vmem:[%s7729_s7 + $0x3cc] sm:$0xf] }
 0x193   :  { %2732 = vmatpush.bf16.msrb.mxu3 %v3954_v51  ;;  %v5320_v51 = vld [vmem:[%s7729_s7 + $0x88c] sm:$0xf0]  ;;  %v3762_v59 = vor.u32 %v5071_v48, %v3759_v50  ;;  %v4143_v48 = vld [vmem:[%s7729_s7 + $0x3e0] sm:$0xf0]  ;;  %v5233_v50 = vld [vmem:[%s7729_s7 + $0x5dc] sm:$0xf] }
 0x194   :  { %v4742_v45 = vor.u32 %v5320_v51, %v4741_v38  ;;  %v4646_v38 = vor.u32 %v5296_v32, %v4645_v31  ;;  %v5290_v51 = vld [vmem:[%s7729_s7 + $0x79c] sm:$0xf0]  ;;  %v5263_v29 = vld [vmem:[%s7729_s7 + $0x6cc] sm:$0xf]  ;;  %v4071_v31 = vld [vmem:[%s7729_s7 + $0x350] sm:$0xf0] }
 0x195   :  { %2670 = vmatpush.bf16.msra.mxu2 %v4070_v60  ;;  %2657 = vmatpush.bf16.msra.mxu1 %v3878_v0  ;;  %v5317_v60 = vld [vmem:[%s7729_s7 + $0x87c] sm:$0xf]  ;;  %v4429_v0 = vld [vmem:[%s7729_s7 + $0x608] sm:$0xf]  ;;  %v5215_v32 = vld [vmem:[%s7729_s7 + $0x54c] sm:$0xf] }
 0x196   :  { %2692 = vmatpush.bf16.msrb.mxu0 %v4550_v4  ;;  %v4693_v4 = vld [vmem:[%s7729_s7 + $0x818] sm:$0xf]  ;;  %v4746_v8 = vor.u32 %v5317_v60, %v4743_v61  ;;  %v4146_v61 = vor.u32 %v5167_v42, %v4143_v48  ;;  %v4311_v42 = vld [vmem:[%s7729_s7 + $0x530] sm:$0xf0] }
 0x197   :  { %2733 = vmatpush.bf16.msrb.mxu3 %v3930_v57  ;;  %v5314_v57 = vld [vmem:[%s7729_s7 + $0x85c] sm:$0xf0]  ;;  %v4694_v16 = vor.u32 %v5308_v6, %v4693_v4  ;;  %v5227_v4 = vld [vmem:[%s7729_s7 + $0x5ac] sm:$0xf]  ;;  %v4383_v6 = vld [vmem:[%s7729_s7 + $0x5c0] sm:$0xf0] }
 0x198   :  { %v4718_v63 = vor.u32 %v5314_v57, %v4717_v54  ;;  %v5293_v57 = vld [vmem:[%s7729_s7 + $0x7bc] sm:$0xf] }
 0x199   :  { %2671 = vmatpush.bf16.msra.mxu2 %v4046_v15  ;;  %2658 = vmatpush.bf16.msra.mxu1 %v3854_v18  ;;  %v4430_v15 = vor.u32 %v5242_v3, %v4429_v0  ;;  %v3711_v18 = vld [vmem:[%s7729_s7 + $0x80] sm:$0xf0]  ;;  %v5275_v0 = vld [vmem:[%s7729_s7 + $0x72c] sm:$0xf]  ;;  %v4119_v3 = vld [vmem:[%s7729_s7 + $0x3b0] sm:$0xf0] }
 0x19a   :  { %2693 = vmatpush.bf16.msrb.mxu0 %v4526_v20  ;;  %v4669_v20 = vld [vmem:[%s7729_s7 + $0x7e8] sm:$0xf] }
 0x19b   :  { %2734 = vmatpush.bf16.msrb.mxu3 %v3906_v11  ;;  %v4215_v11 = vld [vmem:[%s7729_s7 + $0x470] sm:$0xf0] }
 0x19c   :  { %2672 = vmatmul.bf16.vlgmr.msra.gmra.mxu2 %v6222_v47  ;;  %2659 = vmatmul.bf16.vlgmr.msra.gmra.mxu1 %v6227_v52 }
 0x19d   :  { %2716 = vmatpush.bf16.msrb.mxu2 %v3834_v19  ;;  %2703 = vmatpush.bf16.msrb.mxu1 %v4790_v21  ;;  %v4218_v19 = vor.u32 %v5185_v9, %v4215_v11  ;;  %v5302_v21 = vld [vmem:[%s7729_s7 + $0x7fc] sm:$0xf0]  ;;  %v4623_v9 = vld [vmem:[%s7729_s7 + $0x7a0] sm:$0xf0]  ;;  %v4578_v11 = vor.u32 %v5275_v0, %v4575_v1  ;;  %v3813_v0 = vld [vmem:[%s7729_s7 + $0x130] sm:$0xf] }
 0x19e   :  { %2694 = vmatpush.bf16.msrb.mxu0 %v4502_v33  ;;  %v4670_v27 = vor.u32 %v5302_v21, %v4669_v20  ;;  %v4698_v33 = vor.u32 %v5305_v25, %v4695_v26  ;;  %v4095_v20 = vld [vmem:[%s7729_s7 + $0x380] sm:$0xf0]  ;;  %v5221_v21 = vld [vmem:[%s7729_s7 + $0x57c] sm:$0xf]  ;;  %v5231_v25 = vld [vmem:[%s7729_s7 + $0x5c4] sm:$0xf0] }
 0x19f   :  { %2735 = vmatpush.bf16.msrb.mxu3 %v3882_v34  ;;  %v3714_v34 = vor.u32 %v5059_v17, %v3711_v18  ;;  %v5269_v17 = vld [vmem:[%s7729_s7 + $0x6fc] sm:$0xf]  ;;  %v4551_v18 = vld [vmem:[%s7729_s7 + $0x710] sm:$0xf0]  ;;  %v5087_v1 = vld [vmem:[%s7729_s7 + $0x144] sm:$0xf0] }
 0x1a1   :  { %2717 = vmatpush.bf16.msrb.mxu2 %v3810_v30  ;;  %2704 = vmatpush.bf16.msrb.mxu1 %v4766_v35  ;;  %v4194_v30 = vor.u32 %v5179_v23, %v4191_v24  ;;  %v5173_v35 = vld [vmem:[%s7729_s7 + $0x3fc] sm:$0xf]  ;;  %v4554_v24 = vor.u32 %v5269_v17, %v4551_v18  ;;  %v4293_v18 = vld [vmem:[%s7729_s7 + $0x4f0] sm:$0xf] }
 0x1a2   :  { %2695 = vmatpush.bf16.msrb.mxu0 %v4478_v44  ;;  %v4170_v41 = vor.u32 %v5173_v35, %v4167_v36  ;;  %v5281_v44 = vld [vmem:[%s7729_s7 + $0x75c] sm:$0xf] }
 0x1a3   :  { %2736 = vmatpush.bf16.msrb.mxu3 %v3858_v7  ;;  %v4671_v7 = vld [vmem:[%s7729_s7 + $0x800] sm:$0xf0] }
 0x1a4   :  { %v4674_v46 = vor.u32 %v5299_v43, %v4671_v7  ;;  %v5225_v43 = vld [vmem:[%s7729_s7 + $0x594] sm:$0xf0]  ;;  %v4074_v7 = vor.u32 %v5149_v28, %v4071_v31  ;;  %v4221_v28 = vld [vmem:[%s7729_s7 + $0x460] sm:$0xf]  ;;  %v5075_v31 = vld [vmem:[%s7729_s7 + $0xe4] sm:$0xf0] }
 0x1a5   :  { %2718 = vmatpush.bf16.msrb.mxu2 %v3786_v40  ;;  %2705 = vmatpush.bf16.msrb.mxu1 %v4742_v45  ;;  %v3663_v40 = vld [vmem:[%s7729_s7 + $0x20] sm:$0xf0]  ;;  %v4599_v45 = vld [vmem:[%s7729_s7 + $0x770] sm:$0xf0] }
 0x1a6   :  { %2737 = vmatmul.bf16.vlgmr.msrb.gmra.mxu3 %v6227_v52  ;;  %2696 = vmatpush.bf16.msrb.mxu0 %v4454_v62  ;;  %v4602_v60 = vor.u32 %v5281_v44, %v4599_v45  ;;  %v4410_v62 = vor.u32 %v5233_v50, %v4407_v53  ;;  %v3837_v45 = vld [vmem:[%s7729_s7 + $0x160] sm:$0xf]  ;;  %v4341_v50 = vld [vmem:[%s7729_s7 + $0x550] sm:$0xf]  ;;  %v5219_v53 = vld [vmem:[%s7729_s7 + $0x564] sm:$0xf0] }
 0x1a7   :  { %2781 = vmatpush.bf16.msra.mxu3 %v4794_v39  ;;  %v5047_v39 = vld [vmem:[%s7729_s7 + $0xc] sm:$0xf] }
 0x1a8   :  { %v3666_v54 = vor.u32 %v5047_v39, %v3663_v40  ;;  %v4503_v39 = vld [vmem:[%s7729_s7 + $0x6b0] sm:$0xf0]  ;;  %v4047_v40 = vld [vmem:[%s7729_s7 + $0x320] sm:$0xf0] }
 0x1a9   :  { %2719 = vmatpush.bf16.msrb.mxu2 %v3762_v59  ;;  %2706 = vmatpush.bf16.msrb.mxu1 %v4718_v63  ;;  %v4622_v59 = vor.u32 %v5290_v51, %v4621_v10  ;;  %v5161_v63 = vld [vmem:[%s7729_s7 + $0x39c] sm:$0xf] }
 0x1aa   :  { %2697 = vmatpush.bf16.msrb.mxu0 %v4430_v15  ;;  %v4122_v14 = vor.u32 %v5161_v63, %v4119_v3  ;;  %v4386_v15 = vor.u32 %v5227_v4, %v4383_v6  ;;  %v5257_v51 = vld [vmem:[%s7729_s7 + $0x69c] sm:$0xf]  ;;  %v4342_v63 = vor.u32 %v5219_v53, %v4341_v50  ;;  %v4317_v3 = vld [vmem:[%s7729_s7 + $0x520] sm:$0xf]  ;;  %v5213_v4 = vld [vmem:[%s7729_s7 + $0x534] sm:$0xf0] }
 0x1ab   :  { %2782 = vmatpush.bf16.msra.mxu3 %v4770_v58  ;;  %v4647_v58 = vld [vmem:[%s7729_s7 + $0x7d0] sm:$0xf0]  ;;  %v4506_v48 = vor.u32 %v5257_v51, %v4503_v39  ;;  %v3741_v51 = vld [vmem:[%s7729_s7 + $0xa0] sm:$0xf]  ;;  %v4197_v39 = vld [vmem:[%s7729_s7 + $0x430] sm:$0xf] }
 0x1ac   :  { %v4650_v2 = vor.u32 %v5293_v57, %v4647_v58  ;;  %v5251_v58 = vld [vmem:[%s7729_s7 + $0x66c] sm:$0xf]  ;;  %v7047_v50 = vld [vmem:[%s7731_s8] sm:$0x3f] }
 0x1ad   :  { %2720 = vmatpush.bf16.msrb.mxu2 %v3738_v12  ;;  %2707 = vmatpush.bf16.msrb.mxu1 %v4694_v16  ;;  %v4413_v12 = vld [vmem:[%s7729_s7 + $0x5e0] sm:$0xf]  ;;  %v5155_v16 = vld [vmem:[%s7729_s7 + $0x36c] sm:$0xf] }
 0x1ae   :  { %2742 = vmatpush.bf16.msra.mxu0 %v4218_v19  ;;  %v4414_v23 = vor.u32 %v5237_v13, %v4413_v12  ;;  %v4098_v26 = vor.u32 %v5155_v16, %v4095_v20  ;;  %v5197_v12 = vld [vmem:[%s7729_s7 + $0x4bc] sm:$0xf]  ;;  %v4263_v13 = vld [vmem:[%s7729_s7 + $0x4d0] sm:$0xf0]  ;;  %v5081_v16 = vld [vmem:[%s7729_s7 + $0x114] sm:$0xf0] }
 0x1af   :  { %2783 = vmatpush.bf16.msra.mxu3 %v4746_v8  ;;  %2698 = vmatmul.bf16.vlgmr.msrb.gmra.mxu0 %v6337_v56  ;;  %v5287_v8 = vld [vmem:[%s7729_s7 + $0x78c] sm:$0xf] }
 0x1b0   :  { %v4626_v19 = vor.u32 %v5287_v8, %v4623_v9  ;;  %v5245_v8 = vld [vmem:[%s7729_s7 + $0x63c] sm:$0xf]  ;;  %v4455_v9 = vld [vmem:[%s7729_s7 + $0x650] sm:$0xf0]  ;;  %v5191_v20 = vld [vmem:[%s7729_s7 + $0x48c] sm:$0xf] }
 0x1b1   :  { %2721 = vmatpush.bf16.msrb.mxu2 %v3714_v34  ;;  %2708 = vmatpush.bf16.msrb.mxu1 %v4670_v27  ;;  %v4389_v34 = vld [vmem:[%s7729_s7 + $0x5b0] sm:$0xf]  ;;  %v4458_v17 = vor.u32 %v5245_v8, %v4455_v9 }
 0x1b2   :  { %2743 = vmatpush.bf16.msra.mxu0 %v4194_v30  ;;  %v4527_v30 = vld [vmem:[%s7729_s7 + $0x6e0] sm:$0xf0]  ;;  %v4390_v35 = vor.u32 %v5231_v25, %v4389_v34  ;;  %v5239_v34 = vld [vmem:[%s7729_s7 + $0x60c] sm:$0xf] }
 0x1b3   :  { %2784 = vmatpush.bf16.msra.mxu3 %v4722_v22  ;;  %v4359_v22 = vld [vmem:[%s7729_s7 + $0x590] sm:$0xf0]  ;;  %v4530_v36 = vor.u32 %v5263_v29, %v4527_v30  ;;  %v4431_v25 = vld [vmem:[%s7729_s7 + $0x620] sm:$0xf0]  ;;  %v5189_v29 = vld [vmem:[%s7729_s7 + $0x474] sm:$0xf0] }
 0x1b4   :  { %v4362_v27 = vor.u32 %v5221_v21, %v4359_v22 }
 0x1b5   :  { %2722 = vmatpush.bf16.msrb.mxu2 %v3690_v37  ;;  %2709 = vmatpush.bf16.msrb.mxu1 %v4646_v38  ;;  %v4365_v37 = vld [vmem:[%s7729_s7 + $0x580] sm:$0xf]  ;;  %v5143_v38 = vld [vmem:[%s7729_s7 + $0x30c] sm:$0xf] }
 0x1b6   :  { %2744 = vmatpush.bf16.msra.mxu0 %v4170_v41  ;;  %v5209_v41 = vld [vmem:[%s7729_s7 + $0x51c] sm:$0xf]  ;;  %v4366_v44 = vor.u32 %v5225_v43, %v4365_v37  ;;  %v5201_v37 = vld [vmem:[%s7729_s7 + $0x4d4] sm:$0xf0] }
 0x1b7   :  { %2785 = vmatpush.bf16.msra.mxu3 %v4698_v33  ;;  %v4335_v33 = vld [vmem:[%s7729_s7 + $0x560] sm:$0xf0]  ;;  %v4314_v57 = vor.u32 %v5209_v41, %v4311_v42  ;;  %v5069_v42 = vld [vmem:[%s7729_s7 + $0xb4] sm:$0xf0] }
 0x1b8   :  { %v4338_v10 = vor.u32 %v5215_v32, %v4335_v33  ;;  %v4029_v32 = vld [vmem:[%s7729_s7 + $0x2e0] sm:$0xf]  ;;  %v5141_v33 = vld [vmem:[%s7729_s7 + $0x2f4] sm:$0xf0] }
 0x1b9   :  { %2723 = vmatpush.bf16.msrb.mxu2 %v3666_v54  ;;  %2710 = vmatpush.bf16.msrb.mxu1 %v4622_v59  ;;  %v4050_v54 = vor.u32 %v5143_v38, %v4047_v40  ;;  %v4479_v59 = vld [vmem:[%s7729_s7 + $0x680] sm:$0xf0]  ;;  %v4030_v38 = vor.u32 %v5141_v33, %v4029_v32  ;;  %v5183_v40 = vld [vmem:[%s7729_s7 + $0x444] sm:$0xf0]  ;;  %v5165_v32 = vld [vmem:[%s7729_s7 + $0x3b4] sm:$0xf0] }
 0x1ba   :  { %2745 = vmatpush.bf16.msra.mxu0 %v4146_v61  ;;  %v5203_v61 = vld [vmem:[%s7729_s7 + $0x4ec] sm:$0xf]  ;;  %v5051_v33 = vld [vmem:[%s7729_s7 + $0x24] sm:$0xf0] }
 0x1bb   :  { %2786 = vmatpush.bf16.msra.mxu3 %v4674_v46  ;;  %v5093_v46 = vld [vmem:[%s7729_s7 + $0x174] sm:$0xf0] }
 0x1bc   :  { %2724 = vmatmul.bf16.vlgmr.msrb.gmra.mxu2 %v6155_v5  ;;  %2711 = vmatmul.bf16.vlgmr.msrb.gmra.mxu1 %v6329_v49 }
 0x1bd   :  { %2768 = vmatpush.bf16.msra.mxu2 %v4602_v60  ;;  %2755 = vmatpush.bf16.msra.mxu1 %v4410_v62  ;;  %v3838_v60 = vor.u32 %v5093_v46, %v3837_v45  ;;  %v4287_v62 = vld [vmem:[%s7729_s7 + $0x500] sm:$0xf0]  ;;  %v5135_v45 = vld [vmem:[%s7729_s7 + $0x2c4] sm:$0xf0]  ;;  %v4245_v46 = vld [vmem:[%s7729_s7 + $0x490] sm:$0xf] }
 0x1be   :  { %2746 = vmatpush.bf16.msra.mxu0 %v4122_v14  ;;  %v4290_v6 = vor.u32 %v5203_v61, %v4287_v62  ;;  %v4318_v14 = vor.u32 %v5213_v4, %v4317_v3  ;;  %v3717_v62 = vld [vmem:[%s7729_s7 + $0x70] sm:$0xf]  ;;  %v3981_v3 = vld [vmem:[%s7729_s7 + $0x280] sm:$0xf]  ;;  %v5129_v4 = vld [vmem:[%s7729_s7 + $0x294] sm:$0xf0] }
 0x1bf   :  { %2787 = vmatpush.bf16.msra.mxu3 %v4650_v2  ;;  %v4482_v2 = vor.u32 %v5251_v58, %v4479_v59  ;;  %v5138_v58 = vld [vmem:[%s7729_s7 + $0x2e4] sm:$0xf]  ;;  %v4031_v59 = vld [vmem:[%s7729_s7 + $0x2f8] sm:$0xf0] }
 0x1c0   :  { %v4034_v8 = vor.u32 %v5138_v58, %v4031_v59  ;;  %v4581_v58 = vld [vmem:[%s7729_s7 + $0x730] sm:$0xf]  ;;  %v5279_v59 = vld [vmem:[%s7729_s7 + $0x744] sm:$0xf0] }
 0x1c1   :  { %2769 = vmatpush.bf16.msra.mxu2 %v4578_v11  ;;  %2756 = vmatpush.bf16.msra.mxu1 %v4386_v15  ;;  %v3814_v11 = vor.u32 %v5087_v1, %v3813_v0  ;;  %v3789_v15 = vld [vmem:[%s7729_s7 + $0x100] sm:$0xf]  ;;  %v5177_v0 = vld [vmem:[%s7729_s7 + $0x414] sm:$0xf0] }
 0x1c2   :  { %2747 = vmatpush.bf16.msra.mxu0 %v4098_v26  ;;  %v3790_v26 = vor.u32 %v5081_v16, %v3789_v15  ;;  %v3693_v15 = vld [vmem:[%s7729_s7 + $0x40] sm:$0xf]  ;;  %v4149_v16 = vld [vmem:[%s7729_s7 + $0x3d0] sm:$0xf] }
 0x1c3   :  { %2788 = vmatpush.bf16.msra.mxu3 %v4626_v19  ;;  %v5207_v19 = vld [vmem:[%s7729_s7 + $0x504] sm:$0xf0] }
 0x1c4   :  { %v4294_v30 = vor.u32 %v5207_v19, %v4293_v18  ;;  %v5057_v18 = vld [vmem:[%s7729_s7 + $0x54] sm:$0xf0]  ;;  %v3957_v19 = vld [vmem:[%s7729_s7 + $0x250] sm:$0xf] }
 0x1c5   :  { %2770 = vmatpush.bf16.msra.mxu2 %v4554_v24  ;;  %2757 = vmatpush.bf16.msra.mxu1 %v4362_v27  ;;  %v4239_v24 = vld [vmem:[%s7729_s7 + $0x4a0] sm:$0xf0]  ;;  %v3765_v27 = vld [vmem:[%s7729_s7 + $0xd0] sm:$0xf] }
 0x1c6   :  { %2789 = vmatmul.bf16.vlgmr.msra.gmra.mxu3 %v6329_v49  ;;  %2748 = vmatpush.bf16.msra.mxu0 %v4074_v7  ;;  %v4242_v43 = vor.u32 %v5191_v20, %v4239_v24  ;;  %v4222_v7 = vor.u32 %v5189_v29, %v4221_v28  ;;  %v5123_v20 = vld [vmem:[%s7729_s7 + $0x264] sm:$0xf0]  ;;  %v3694_v29 = vor.u32 %v5057_v18, %v3693_v15  ;;  %v3861_v15 = vld [vmem:[%s7729_s7 + $0x190] sm:$0xf] }
 0x1c7   :  { %2833 = vmatpush.bf16.msrb.mxu3 %v4414_v23  ;;  %v4266_v23 = vor.u32 %v5197_v12, %v4263_v13  ;;  %v4007_v12 = vld [vmem:[%s7729_s7 + $0x2c8] sm:$0xf0]  ;;  %v5099_v18 = vld [vmem:[%s7729_s7 + $0x1a4] sm:$0xf0] }
 0x1c9   :  { %2771 = vmatpush.bf16.msra.mxu2 %v4530_v36  ;;  %2758 = vmatpush.bf16.msra.mxu1 %v4338_v10  ;;  %v6983_v21 = vpop.f32.mrf.mxu0  ;;  %v6985_v22 = vpop.f32.mrf.mxu3  ;;  %v4269_v36 = vld [vmem:[%s7729_s7 + $0x4c0] sm:$0xf]  ;;  %v3766_v10 = vor.u32 %v5075_v31, %v3765_v27  ;;  %v3983_v27 = vld [vmem:[%s7729_s7 + $0x298] sm:$0xf0] }
 0x1ca   :  { %2749 = vmatpush.bf16.msra.mxu0 %v4050_v54  ;;  %v4270_v41 = vor.u32 %v5201_v37, %v4269_v36  ;;  %v4125_v31 = vld [vmem:[%s7729_s7 + $0x3a0] sm:$0xf]  ;;  %v5117_v36 = vld [vmem:[%s7729_s7 + $0x234] sm:$0xf0] }
 0x1cb   :  { %2834 = vmatpush.bf16.msrb.mxu3 %v4390_v35  ;;  %v4434_v35 = vor.u32 %v5239_v34, %v4431_v25 }
 0x1cd   :  { %2772 = vmatpush.bf16.msra.mxu2 %v4506_v48  ;;  %2759 = vmatpush.bf16.msra.mxu1 %v4314_v57  ;;  %v5195_v48 = vld [vmem:[%s7729_s7 + $0x4a4] sm:$0xf0]  ;;  %v4198_v57 = vor.u32 %v5183_v40, %v4197_v39 }
 0x1ce   :  { %2794 = vmatpush.bf16.msrb.mxu0 %v3838_v60  ;;  %v3742_v60 = vor.u32 %v5069_v42, %v3741_v51  ;;  %v4246_v1 = vor.u32 %v5195_v48, %v4245_v46  ;;  %v3959_v51 = vld [vmem:[%s7729_s7 + $0x268] sm:$0xf0]  ;;  %v4101_v42 = vld [vmem:[%s7729_s7 + $0x370] sm:$0xf] }
 0x1cf   :  { %2835 = vmatpush.bf16.msrb.mxu3 %v4366_v44  ;;  %2750 = vmatmul.bf16.vlgmr.msra.gmra.mxu0 %v6222_v47  ;;  %v4005_v44 = vld [vmem:[%s7729_s7 + $0x2b0] sm:$0xf] }
 0x1d0   :  { %v4006_v61 = vor.u32 %v5135_v45, %v4005_v44  ;;  %v5159_v44 = vld [vmem:[%s7729_s7 + $0x384] sm:$0xf0] }
 0x1d1   :  { %2773 = vmatpush.bf16.msra.mxu2 %v4482_v2  ;;  %2760 = vmatpush.bf16.msra.mxu1 %v4290_v6  ;;  %v2493_v53 = vpop.f32.mrf.mxu0  ;;  %v2532_v54 = vpop.f32.mrf.mxu3  ;;  %v5063_v2 = vld [vmem:[%s7729_s7 + $0x84] sm:$0xf0]  ;;  %v1030_v6 = vperm.slane %v7047_v50, 0 }
 0x1d2   :  { %2795 = vmatpush.bf16.msrb.mxu0 %v3814_v11  ;;  %v5132_v11 = vld [vmem:[%s7729_s7 + $0x2b4] sm:$0xf]  ;;  %v3718_v13 = vor.u32 %v5063_v2, %v3717_v62  ;;  %v3909_v53 = vld [vmem:[%s7729_s7 + $0x1f0] sm:$0xf]  ;;  %v5111_v54 = vld [vmem:[%s7729_s7 + $0x204] sm:$0xf0] }
 0x1d3   :  { %2836 = vmatpush.bf16.msrb.mxu3 %v4342_v63  ;;  %v4173_v63 = vld [vmem:[%s7729_s7 + $0x400] sm:$0xf]  ;;  %v4010_v24 = vor.u32 %v5132_v11, %v4007_v12  ;;  %v5114_v62 = vld [vmem:[%s7729_s7 + $0x224] sm:$0xf]  ;;  %v5273_v11 = vld [vmem:[%s7729_s7 + $0x714] sm:$0xf0] }
 0x1d4   :  { %v4174_v9 = vor.u32 %v5177_v0, %v4173_v63  ;;  %v3935_v63 = vld [vmem:[%s7729_s7 + $0x238] sm:$0xf0]  ;;  %v4077_v2 = vld [vmem:[%s7729_s7 + $0x340] sm:$0xf] }
 0x1d5   :  { %2774 = vmatpush.bf16.msra.mxu2 %v4458_v17  ;;  %2761 = vmatpush.bf16.msra.mxu1 %v4266_v23  ;;  %v5171_v17 = vld [vmem:[%s7729_s7 + $0x3e4] sm:$0xf0]  ;;  %v2492_v23 = vadd.f32 %v6983_v21, %v1030_v6  ;;  %v3669_v21 = vld [vmem:[%s7729_s7 + $0x10] sm:$0xf]  ;;  %v3885_v6 = vld [vmem:[%s7729_s7 + $0x1c0] sm:$0xf] }
 0x1d6   :  { %2796 = vmatpush.bf16.msrb.mxu0 %v3790_v26  ;;  %v4150_v25 = vor.u32 %v5171_v17, %v4149_v16  ;;  %v5126_v26 = vld [vmem:[%s7729_s7 + $0x284] sm:$0xf]  ;;  %v3670_v40 = vor.u32 %v5051_v33, %v3669_v21  ;;  %v3887_v33 = vld [vmem:[%s7729_s7 + $0x1d8] sm:$0xf0] }
 0x1d7   :  { %2837 = vmatpush.bf16.msrb.mxu3 %v4318_v14  ;;  %v3982_v14 = vor.u32 %v5129_v4, %v3981_v3  ;;  %v3986_v37 = vor.u32 %v5126_v26, %v3983_v27  ;;  %v5153_v3 = vld [vmem:[%s7729_s7 + $0x354] sm:$0xf0]  ;;  %v4582_v4 = vor.u32 %v5279_v59, %v4581_v58  ;;  %v3839_v26 = vld [vmem:[%s7729_s7 + $0x178] sm:$0xf0]  ;;  %v5330_v59 = vld [vmem:[%s7729_s7 + $0x8e4] sm:$0xf] }
 0x1d8   :  { %v4078_v12 = vor.u32 %v5153_v3, %v4077_v2  ;;  %v3791_v2 = vld [vmem:[%s7729_s7 + $0x118] sm:$0xf0] }
 0x1d9   :  { %2775 = vmatpush.bf16.msra.mxu2 %v4434_v35  ;;  %2762 = vmatpush.bf16.msra.mxu1 %v4242_v43  ;;  %v2504_v34 = vpop.f32.mrf.mxu1  ;;  %v3933_v35 = vld [vmem:[%s7729_s7 + $0x220] sm:$0xf] }
 0x1da   :  { %2797 = vmatpush.bf16.msrb.mxu0 %v3766_v10  ;;  %v2505_v28 = vadd.f32 %v2504_v34, %v2492_v23  ;;  %v4605_v43 = vld [vmem:[%s7729_s7 + $0x760] sm:$0xf]  ;;  %v4126_v10 = vor.u32 %v5165_v32, %v4125_v31  ;;  %v4533_v34 = vld [vmem:[%s7729_s7 + $0x6d0] sm:$0xf]  ;;  %v5102_v32 = vld [vmem:[%s7729_s7 + $0x1c4] sm:$0xf] }
 0x1db   :  { %2838 = vmatpush.bf16.msrb.mxu3 %v4294_v30  ;;  %v3958_v30 = vor.u32 %v5123_v20, %v3957_v19  ;;  %v4053_v19 = vld [vmem:[%s7729_s7 + $0x310] sm:$0xf]  ;;  %v5147_v20 = vld [vmem:[%s7729_s7 + $0x324] sm:$0xf0] }
 0x1dc   :  { %2776 = vmatmul.bf16.vlgmr.msra.gmra.mxu2 %v6337_v56  ;;  %2763 = vmatmul.bf16.vlgmr.msra.gmra.mxu1 %v6134_v55  ;;  %v4054_v31 = vor.u32 %v5147_v20, %v4053_v19  ;;  %v4461_v19 = vld [vmem:[%s7729_s7 + $0x640] sm:$0xf]  ;;  %v3767_v20 = vld [vmem:[%s7729_s7 + $0xe8] sm:$0xf0] }
 0x1dd   :  { %2820 = vmatpush.bf16.msrb.mxu2 %v4222_v7  ;;  %2807 = vmatpush.bf16.msrb.mxu1 %v4030_v38  ;;  %v5285_v7 = vld [vmem:[%s7729_s7 + $0x774] sm:$0xf0]  ;;  %v5120_v38 = vld [vmem:[%s7729_s7 + $0x254] sm:$0xf] }
 0x1de   :  { %2798 = vmatpush.bf16.msrb.mxu0 %v3742_v60  ;;  %v2517_v39 = vpop.f32.mrf.mxu2  ;;  %v4606_v48 = vor.u32 %v5285_v7, %v4605_v43  ;;  %v1031_v7 = vperm.slane %v7047_v50, 1 }
 0x1df   :  { %2839 = vmatpush.bf16.msrb.mxu3 %v4270_v41  ;;  %v3934_v41 = vor.u32 %v5117_v36, %v3933_v35  ;;  %v2518_v45 = vadd.f32 %v2517_v39, %v2505_v28  ;;  %v7144_v46 = vpop.f32.mrf.mxu3  ;;  %v5267_v28 = vld [vmem:[%s7729_s7 + $0x6e4] sm:$0xf0]  ;;  %v5084_v39 = vld [vmem:[%s7729_s7 + $0x134] sm:$0xf] }
 0x1e1   :  { %2821 = vmatpush.bf16.msrb.mxu2 %v4198_v57  ;;  %2808 = vmatpush.bf16.msrb.mxu1 %v4006_v61  ;;  %v3962_v57 = vor.u32 %v5120_v38, %v3959_v51  ;;  %v2506_v60 = vpop.f32.mrf.mxu1  ;;  %v4102_v61 = vor.u32 %v5159_v44, %v4101_v42  ;;  %v2531_v0 = vadd.f32 %v6985_v22, %v2518_v45  ;;  %v5105_v22 = vld [vmem:[%s7729_s7 + $0x1d4] sm:$0xf0]  ;;  %v4509_v51 = vld [vmem:[%s7729_s7 + $0x6a0] sm:$0xf]  ;;  %v4773_v45 = vld [vmem:[%s7729_s7 + $0x8b0] sm:$0xf] }
 0x1e2   :  { %2799 = vmatpush.bf16.msrb.mxu0 %v3718_v13  ;;  %v5108_v13 = vld [vmem:[%s7729_s7 + $0x1f4] sm:$0xf]  ;;  %v3886_v17 = vor.u32 %v5105_v22, %v3885_v6  ;;  %v3890_v42 = vor.u32 %v5102_v32, %v3887_v33  ;;  %v5261_v44 = vld [vmem:[%s7729_s7 + $0x6b4] sm:$0xf0]  ;;  %v4799_v60 = vld [vmem:[%s7729_s7 + $0x8f8] sm:$0xf0] }
 0x1e3   :  { %2840 = vmatpush.bf16.msrb.mxu3 %v4246_v1  ;;  %v3910_v1 = vor.u32 %v5111_v54, %v3909_v53  ;;  %v5096_v53 = vld [vmem:[%s7729_s7 + $0x194] sm:$0xf]  ;;  %v3863_v54 = vld [vmem:[%s7729_s7 + $0x1a8] sm:$0xf0]  ;;  %v4749_v6 = vld [vmem:[%s7729_s7 + $0x880] sm:$0xf] }
 0x1e4   :  { %v3866_v3 = vor.u32 %v5096_v53, %v3863_v54  ;;  %v5321_v22 = vld [vmem:[%s7729_s7 + $0x894] sm:$0xf0]  ;;  %v5066_v32 = vld [vmem:[%s7729_s7 + $0xa4] sm:$0xf]  ;;  %v3743_v33 = vld [vmem:[%s7729_s7 + $0xb8] sm:$0xf0] }
 0x1e5   :  { %2822 = vmatpush.bf16.msrb.mxu2 %v4174_v9  ;;  %2809 = vmatpush.bf16.msrb.mxu1 %v3982_v14  ;;  %v4557_v9 = vld [vmem:[%s7729_s7 + $0x700] sm:$0xf]  ;;  %v3911_v14 = vld [vmem:[%s7729_s7 + $0x208] sm:$0xf0]  ;;  %v5060_v53 = vld [vmem:[%s7729_s7 + $0x74] sm:$0xf] }
 0x1e6   :  { %2841 = vmatmul.bf16.vlgmr.msrb.gmra.mxu3 %v6134_v55  ;;  %2800 = vmatpush.bf16.msrb.mxu0 %v3694_v29  ;;  %v2519_v16 = vpop.f32.mrf.mxu2  ;;  %v3914_v27 = vor.u32 %v5108_v13, %v3911_v14  ;;  %v4797_v29 = vld [vmem:[%s7729_s7 + $0x8e0] sm:$0xf]  ;;  %v3719_v54 = vld [vmem:[%s7729_s7 + $0x88] sm:$0xf0] }
 0x1e7   :  { %2885 = vmatpush.bf16.msra.mxu3 %v4034_v8  ;;  %v3938_v8 = vor.u32 %v5114_v62, %v3935_v63  ;;  %v2584_v23 = vpop.f32.mrf.mxu3  ;;  %v4510_v62 = vor.u32 %v5261_v44, %v4509_v51  ;;  %v4775_v16 = vld [vmem:[%s7729_s7 + $0x8c8] sm:$0xf0] }
 0x1e8   :  { %v5249_v23 = vld [vmem:[%s7729_s7 + $0x654] sm:$0xf0]  ;;  %v4727_v44 = vld [vmem:[%s7729_s7 + $0x868] sm:$0xf0] }
 0x1e9   :  { %2823 = vmatpush.bf16.msrb.mxu2 %v4150_v25  ;;  %2810 = vmatpush.bf16.msrb.mxu1 %v3958_v30  ;;  %v5090_v25 = vld [vmem:[%s7729_s7 + $0x164] sm:$0xf]  ;;  %v5333_v30 = vld [vmem:[%s7729_s7 + $0x8f4] sm:$0xf0]  ;;  %v2543_v21 = vpop.f32.mrf.mxu0  ;;  %v2556_v36 = vpop.f32.mrf.mxu1 }
 0x1ea   :  { %2801 = vmatpush.bf16.msrb.mxu0 %v3670_v40  ;;  %v2544_v35 = vadd.f32 %v2543_v21, %v2531_v0  ;;  %v3842_v43 = vor.u32 %v5090_v25, %v3839_v26  ;;  %v4798_v38 = vor.u32 %v5333_v30, %v4797_v29  ;;  %v3815_v40 = vld [vmem:[%s7729_s7 + $0x148] sm:$0xf0]  ;;  %v4485_v0 = vld [vmem:[%s7729_s7 + $0x670] sm:$0xf]  ;;  %v4751_v29 = vld [vmem:[%s7729_s7 + $0x898] sm:$0xf0]  ;;  %v4462_v30 = vor.u32 %v5249_v23, %v4461_v19 }
 0x1eb   :  { %2886 = vmatpush.bf16.msra.mxu3 %v4010_v24  ;;  %v4558_v24 = vor.u32 %v5273_v11, %v4557_v9  ;;  %v3818_v58 = vor.u32 %v5084_v39, %v3815_v40  ;;  %v4802_v11 = vor.u32 %v5330_v59, %v4799_v60  ;;  %v3746_v40 = vor.u32 %v5066_v32, %v3743_v33  ;;  %v4677_v59 = vld [vmem:[%s7729_s7 + $0x7f0] sm:$0xf]  ;;  %v5303_v60 = vld [vmem:[%s7729_s7 + $0x804] sm:$0xf0]  ;;  %v5234_v32 = vld [vmem:[%s7729_s7 + $0x5e4] sm:$0xf] }
 0x1ec   :  { %v4629_v23 = vld [vmem:[%s7729_s7 + $0x790] sm:$0xf]  ;;  %v4415_v33 = vld [vmem:[%s7729_s7 + $0x5f8] sm:$0xf0] }
 0x1ed   :  { %2824 = vmatpush.bf16.msrb.mxu2 %v4126_v10  ;;  %2811 = vmatpush.bf16.msrb.mxu1 %v3934_v41  ;;  %v4534_v10 = vor.u32 %v5267_v28, %v4533_v34  ;;  %v7236_v41 = vadd.f32 %v2556_v36, %v2544_v35  ;;  %v5315_v34 = vld [vmem:[%s7729_s7 + $0x864] sm:$0xf0]  ;;  %v5318_v28 = vld [vmem:[%s7729_s7 + $0x884] sm:$0xf]  ;;  %v4701_v36 = vld [vmem:[%s7729_s7 + $0x820] sm:$0xf] }
 0x1ee   :  { %2846 = vmatpush.bf16.msra.mxu0 %v4606_v48  ;;  %v5327_v48 = vld [vmem:[%s7729_s7 + $0x8c4] sm:$0xf0] }
 0x1ef   :  { %2887 = vmatpush.bf16.msra.mxu3 %v3986_v37  ;;  %2802 = vmatmul.bf16.vlgmr.msrb.gmra.mxu0 %v6155_v5  ;;  %v3862_v37 = vor.u32 %v5099_v18, %v3861_v15  ;;  %v4774_v63 = vor.u32 %v5327_v48, %v4773_v45  ;;  %v5324_v15 = vld [vmem:[%s7729_s7 + $0x8b4] sm:$0xf]  ;;  %v4750_v18 = vor.u32 %v5321_v22, %v4749_v6  ;;  %v5243_v35 = vld [vmem:[%s7729_s7 + $0x624] sm:$0xf0]  ;;  %v3695_v6 = vld [vmem:[%s7729_s7 + $0x58] sm:$0xf0] }
 0x1f0   :  { %v4778_v25 = vor.u32 %v5324_v15, %v4775_v16  ;;  %v5174_v16 = vld [vmem:[%s7729_s7 + $0x404] sm:$0xf] }
 0x1f1   :  { %2825 = vmatpush.bf16.msrb.mxu2 %v4102_v61  ;;  %2812 = vmatpush.bf16.msrb.mxu1 %v3910_v1  ;;  %v5078_v1 = vld [vmem:[%s7729_s7 + $0x104] sm:$0xf]  ;;  %v2545_v9 = vpop.f32.mrf.mxu0  ;;  %v2558_v13 = vpop.f32.mrf.mxu1 }
 0x1f2   :  { %2847 = vmatpush.bf16.msra.mxu0 %v4582_v4  ;;  %v5255_v4 = vld [vmem:[%s7729_s7 + $0x684] sm:$0xf0]  ;;  %v3794_v14 = vor.u32 %v5078_v1, %v3791_v2  ;;  %v5306_v1 = vld [vmem:[%s7729_s7 + $0x824] sm:$0xf]  ;;  %v4703_v2 = vld [vmem:[%s7729_s7 + $0x838] sm:$0xf0] }
 0x1f3   :  { %2888 = vmatpush.bf16.msra.mxu3 %v3962_v57  ;;  %v2569_v57 = vpop.f32.mrf.mxu2  ;;  %v4706_v15 = vor.u32 %v5306_v1, %v4703_v2  ;;  %v4103_v2 = vld [vmem:[%s7729_s7 + $0x388] sm:$0xf0] }
 0x1f4   :  { %v2570_v61 = vadd.f32 %v2569_v57, %v1031_v7 }
 0x1f5   :  { %2826 = vmatpush.bf16.msrb.mxu2 %v4078_v12  ;;  %2813 = vmatpush.bf16.msrb.mxu1 %v3886_v17  ;;  %v4486_v17 = vor.u32 %v5255_v4, %v4485_v0  ;;  %v3722_v0 = vor.u32 %v5060_v53, %v3719_v54  ;;  %v5054_v4 = vld [vmem:[%s7729_s7 + $0x44] sm:$0xf]  ;;  %v4391_v53 = vld [vmem:[%s7729_s7 + $0x5c8] sm:$0xf0]  ;;  %v5288_v54 = vld [vmem:[%s7729_s7 + $0x794] sm:$0xf] }
 0x1f6   :  { %2848 = vmatpush.bf16.msra.mxu0 %v4558_v24  ;;  %v2583_v12 = vadd.f32 %v7144_v46, %v2570_v61  ;;  %v5072_v46 = vld [vmem:[%s7729_s7 + $0xd4] sm:$0xf]  ;;  %v4725_v24 = vld [vmem:[%s7729_s7 + $0x850] sm:$0xf]  ;;  %v3698_v19 = vor.u32 %v5054_v4, %v3695_v6  ;;  %v4367_v4 = vld [vmem:[%s7729_s7 + $0x598] sm:$0xf0] }
 0x1f7   :  { %2889 = vmatpush.bf16.msra.mxu3 %v3938_v8  ;;  %v7278_v8 = vpop.f32.mrf.mxu3  ;;  %v4726_v21 = vor.u32 %v5315_v34, %v4725_v24 }
 0x1f9   :  { %2827 = vmatpush.bf16.msrb.mxu2 %v4054_v31  ;;  %2814 = vmatpush.bf16.msrb.mxu1 %v3862_v37  ;;  %v4437_v31 = vld [vmem:[%s7729_s7 + $0x610] sm:$0xf]  ;;  %v5309_v37 = vld [vmem:[%s7729_s7 + $0x834] sm:$0xf0]  ;;  %v2595_v7 = vpop.f32.mrf.mxu0  ;;  %v2608_v39 = vpop.f32.mrf.mxu1 }
 0x1fa   :  { %2849 = vmatpush.bf16.msra.mxu0 %v4534_v10  ;;  %v4754_v10 = vor.u32 %v5318_v28, %v4751_v29  ;;  %v2596_v51 = vadd.f32 %v2595_v7, %v2583_v12  ;;  %v4438_v45 = vor.u32 %v5243_v35, %v4437_v31  ;;  %v4702_v48 = vor.u32 %v5309_v37, %v4701_v36  ;;  %v5297_v12 = vld [vmem:[%s7729_s7 + $0x7d4] sm:$0xf0]  ;;  %v5282_v29 = vld [vmem:[%s7729_s7 + $0x764] sm:$0xf]  ;;  %v4151_v31 = vld [vmem:[%s7729_s7 + $0x3e8] sm:$0xf0] }
 0x1fb   :  { %2890 = vmatpush.bf16.msra.mxu3 %v3914_v27  ;;  %v2571_v26 = vpop.f32.mrf.mxu2  ;;  %v3770_v27 = vor.u32 %v5072_v46, %v3767_v20  ;;  %v5300_v46 = vld [vmem:[%s7729_s7 + $0x7f4] sm:$0xf]  ;;  %v4679_v20 = vld [vmem:[%s7729_s7 + $0x808] sm:$0xf0]  ;;  %v5294_v36 = vld [vmem:[%s7729_s7 + $0x7c4] sm:$0xf] }
 0x1fc   :  { %2828 = vmatmul.bf16.vlgmr.msrb.gmra.mxu2 %v6222_v47  ;;  %2815 = vmatmul.bf16.vlgmr.msrb.gmra.mxu1 %v6227_v52  ;;  %v2609_v57 = vadd.f32 %v2608_v39, %v2596_v51  ;;  %v5048_v26 = vld [vmem:[%s7729_s7 + $0x14] sm:$0xf]  ;;  %v4655_v37 = vld [vmem:[%s7729_s7 + $0x7d8] sm:$0xf0]  ;;  %v4418_v51 = vor.u32 %v5234_v32, %v4415_v33  ;;  %v5162_v39 = vld [vmem:[%s7729_s7 + $0x3a4] sm:$0xf] }
 0x1fd   :  { %2872 = vmatpush.bf16.msra.mxu2 %v3842_v43  ;;  %2859 = vmatpush.bf16.msra.mxu1 %v4798_v38  ;;  %v4223_v38 = vld [vmem:[%s7729_s7 + $0x478] sm:$0xf0]  ;;  %v5204_v32 = vld [vmem:[%s7729_s7 + $0x4f4] sm:$0xf]  ;;  %v4295_v33 = vld [vmem:[%s7729_s7 + $0x508] sm:$0xf0] }
 0x1fe   :  { %2850 = vmatpush.bf16.msra.mxu0 %v4510_v62  ;;  %v5180_v62 = vld [vmem:[%s7729_s7 + $0x434] sm:$0xf] }
 0x1ff   :  { %2891 = vmatpush.bf16.msra.mxu3 %v3890_v42  ;;  %v2636_v43 = vpop.f32.mrf.mxu3  ;;  %v5312_v42 = vld [vmem:[%s7729_s7 + $0x854] sm:$0xf] }
 0x200   :  { %v4730_v61 = vor.u32 %v5312_v42, %v4727_v44  ;;  %v4583_v42 = vld [vmem:[%s7729_s7 + $0x748] sm:$0xf0]  ;;  %v4658_v44 = vor.u32 %v5294_v36, %v4655_v37  ;;  %v4298_v37 = vor.u32 %v5204_v32, %v4295_v33 }
 0x201   :  { %2873 = vmatpush.bf16.msra.mxu2 %v3818_v58  ;;  %2860 = vmatpush.bf16.msra.mxu1 %v4774_v63  ;;  %v4199_v63 = vld [vmem:[%s7729_s7 + $0x448] sm:$0xf0] }
 0x202   :  { %2851 = vmatpush.bf16.msra.mxu0 %v4486_v17  ;;  %v4202_v9 = vor.u32 %v5180_v62, %v4199_v63  ;;  %v4175_v17 = vld [vmem:[%s7729_s7 + $0x418] sm:$0xf0]  ;;  %v5156_v62 = vld [vmem:[%s7729_s7 + $0x374] sm:$0xf]  ;;  %v5270_v63 = vld [vmem:[%s7729_s7 + $0x704] sm:$0xf] }
 0x203   :  { %2892 = vmatpush.bf16.msra.mxu3 %v3866_v3  ;;  %v4678_v3 = vor.u32 %v5303_v60, %v4677_v59  ;;  %v2621_v22 = vpop.f32.mrf.mxu2  ;;  %v4178_v28 = vor.u32 %v5174_v16, %v4175_v17  ;;  %v4343_v16 = vld [vmem:[%s7729_s7 + $0x568] sm:$0xf0] }
 0x204   :  { %v2622_v13 = vadd.f32 %v2621_v22, %v2609_v57  ;;  %v4631_v57 = vld [vmem:[%s7729_s7 + $0x7a8] sm:$0xf0] }
 0x205   :  { %2874 = vmatpush.bf16.msra.mxu2 %v3794_v14  ;;  %2861 = vmatpush.bf16.msra.mxu1 %v4750_v18  ;;  %v2597_v14 = vpop.f32.mrf.mxu0  ;;  %v2610_v18 = vpop.f32.mrf.mxu1  ;;  %v4634_v1 = vor.u32 %v5288_v54, %v4631_v57  ;;  %v4247_v54 = vld [vmem:[%s7729_s7 + $0x4a8] sm:$0xf0] }
 0x206   :  { %2893 = vmatmul.bf16.vlgmr.msra.gmra.mxu3 %v6227_v52  ;;  %v5186_v52 = vld [vmem:[%s7729_s7 + $0x464] sm:$0xf]  ;;  %2852 = vmatpush.bf16.msra.mxu0 %v4462_v30  ;;  %v7396_v24 = vadd.f32 %v7278_v8, %v2622_v13  ;;  %v5168_v8 = vld [vmem:[%s7729_s7 + $0x3d4] sm:$0xf]  ;;  %v4607_v30 = vld [vmem:[%s7729_s7 + $0x778] sm:$0xf0] }
 0x207   :  { %2937 = vmatpush.bf16.msrb.mxu3 %v4802_v11  ;;  %v4226_v58 = vor.u32 %v5186_v52, %v4223_v38  ;;  %v4653_v11 = vld [vmem:[%s7729_s7 + $0x7c0] sm:$0xf]  ;;  %v4154_v38 = vor.u32 %v5168_v8, %v4151_v31  ;;  %v4535_v13 = vld [vmem:[%s7729_s7 + $0x6e8] sm:$0xf0]  ;;  %v4079_v14 = vld [vmem:[%s7729_s7 + $0x358] sm:$0xf0] }
 0x208   :  { %v4654_v34 = vor.u32 %v5297_v12, %v4653_v11  ;;  %v5150_v11 = vld [vmem:[%s7729_s7 + $0x344] sm:$0xf]  ;;  %v5264_v12 = vld [vmem:[%s7729_s7 + $0x6d4] sm:$0xf]  ;;  %v5341_v31 = vld [vmem:[%s7732_s9 + $0x38] sm:$0xff] }
 0x209   :  { %2875 = vmatpush.bf16.msra.mxu2 %v3770_v27  ;;  %2862 = vmatpush.bf16.msra.mxu1 %v4726_v21  ;;  %v3671_v27 = vld [vmem:[%s7729_s7 + $0x28] sm:$0xf0]  ;;  %v4682_v21 = vor.u32 %v5300_v46, %v4679_v20  ;;  %v7431_v43 = vpop.f32.mrf.mxu3  ;;  %v4538_v18 = vor.u32 %v5264_v12, %v4535_v13  ;;  %v5144_v20 = vld [vmem:[%s7729_s7 + $0x314] sm:$0xf]  ;;  %v1032_v12 = vperm.slane %v7047_v50, 2 }
 0x20a   :  { %2853 = vmatpush.bf16.msra.mxu0 %v4438_v45  ;;  %v3674_v35 = vor.u32 %v5048_v26, %v3671_v27  ;;  %v4127_v45 = vld [vmem:[%s7729_s7 + $0x3b8] sm:$0xf0]  ;;  %v5210_v26 = vld [vmem:[%s7729_s7 + $0x524] sm:$0xf]  ;;  %v5343_v33 = vld [vmem:[%s7732_s9 + $0x48] sm:$0xff] }
 0x20b   :  { %2938 = vmatpush.bf16.msrb.mxu3 %v4778_v25  ;;  %v5291_v25 = vld [vmem:[%s7729_s7 + $0x7a4] sm:$0xf0]  ;;  %v2623_v52 = vpop.f32.mrf.mxu2  ;;  %v4130_v60 = vor.u32 %v5162_v39, %v4127_v45  ;;  %v4319_v27 = vld [vmem:[%s7729_s7 + $0x538] sm:$0xf0]  ;;  %v4439_v45 = vld [vmem:[%s7729_s7 + $0x628] sm:$0xf0] }
 0x20c   :  { %v4630_v7 = vor.u32 %v5291_v25, %v4629_v23  ;;  %v5258_v23 = vld [vmem:[%s7729_s7 + $0x6a4] sm:$0xf]  ;;  %v4055_v25 = vld [vmem:[%s7729_s7 + $0x328] sm:$0xf0]  ;;  %v5340_v52 = vld [vmem:[%s7732_s9 + $0x30] sm:$0xff] }
 0x20d   :  { %2876 = vmatpush.bf16.msra.mxu2 %v3746_v40  ;;  %2863 = vmatpush.bf16.msra.mxu1 %v4702_v48  ;;  %v5276_v40 = vld [vmem:[%s7729_s7 + $0x734] sm:$0xf] }
 0x20e   :  { %2898 = vmatpush.bf16.msrb.mxu0 %v4226_v58  ;;  %v5228_v48 = vld [vmem:[%s7729_s7 + $0x5b4] sm:$0xf]  ;;  %v7457_v58 = vpop.f32.mrf.mxu0  ;;  %v4586_v59 = vor.u32 %v5276_v40, %v4583_v42 }
 0x20f   :  { %2939 = vmatpush.bf16.msrb.mxu3 %v4754_v10  ;;  %2854 = vmatmul.bf16.vlgmr.msra.gmra.mxu0 %v6337_v56  ;;  %v4610_v10 = vor.u32 %v5282_v29, %v4607_v30  ;;  %v4058_v29 = vor.u32 %v5144_v20, %v4055_v25  ;;  %v5252_v30 = vld [vmem:[%s7729_s7 + $0x674] sm:$0xf]  ;;  %v5345_v25 = vld [vmem:[%s7732_s9 + $0x58] sm:$0xff] }
 0x211   :  { %2877 = vmatpush.bf16.msra.mxu2 %v3722_v0  ;;  %2864 = vmatpush.bf16.msra.mxu1 %v4678_v3  ;;  %v4559_v0 = vld [vmem:[%s7729_s7 + $0x718] sm:$0xf0]  ;;  %v5222_v3 = vld [vmem:[%s7729_s7 + $0x584] sm:$0xf]  ;;  %v2688_v6 = vpop.f32.mrf.mxu3 }
 0x212   :  { %2899 = vmatpush.bf16.msrb.mxu0 %v4202_v9  ;;  %v4562_v22 = vor.u32 %v5270_v63, %v4559_v0  ;;  %v4370_v9 = vor.u32 %v5222_v3, %v4367_v4  ;;  %v5364_v63 = vld [vmem:[%s7732_s9 + $0xf0] sm:$0xff]  ;;  %v5338_v0 = vld [vmem:[%s7732_s9 + $0x20] sm:$0xff]  ;;  %v5363_v4 = vld [vmem:[%s7732_s9 + $0xe8] sm:$0xff] }
 0x213   :  { %2940 = vmatpush.bf16.msrb.mxu3 %v4730_v61  ;;  %v4394_v61 = vor.u32 %v5228_v48, %v4391_v53  ;;  %v5365_v48 = vld [vmem:[%s7732_s9 + $0xf8] sm:$0xff]  ;;  %v5192_v53 = vld [vmem:[%s7729_s7 + $0x494] sm:$0xf] }
 0x214   :  { %v5356_v3 = vld [vmem:[%s7732_s9 + $0xb0] sm:$0xff]  ;;  %v5337_v6 = vld [vmem:[%s7732_s9 + $0x18] sm:$0xff] }
 0x215   :  { %2878 = vmatpush.bf16.msra.mxu2 %v3698_v19  ;;  %2865 = vmatpush.bf16.msra.mxu1 %v4654_v34  ;;  %v4082_v19 = vor.u32 %v5150_v11, %v4079_v14  ;;  %v4511_v34 = vld [vmem:[%s7729_s7 + $0x6b8] sm:$0xf0]  ;;  %v5362_v11 = vld [vmem:[%s7732_s9 + $0xe0] sm:$0xff] }
 0x216   :  { %2900 = vmatpush.bf16.msrb.mxu0 %v4178_v28  ;;  %v2649_v17 = vpop.f32.mrf.mxu0  ;;  %v4514_v8 = vor.u32 %v5258_v23, %v4511_v34  ;;  %v5354_v14 = vld [vmem:[%s7732_s9 + $0xa0] sm:$0xff] }
 0x217   :  { %2941 = vmatpush.bf16.msrb.mxu3 %v4706_v15  ;;  %v5216_v15 = vld [vmem:[%s7729_s7 + $0x554] sm:$0xf]  ;;  %v5335_v17 = vld [vmem:[%s7732_s9 + $0x8] sm:$0xff]  ;;  %v5334_v34 = vld [vmem:[%s7732_s9] sm:$0xff] }
 0x218   :  { %v4346_v46 = vor.u32 %v5216_v15, %v4343_v16  ;;  %v5361_v15 = vld [vmem:[%s7732_s9 + $0xd8] sm:$0xff]  ;;  %v2648_v16 = vadd.f32 %v7457_v58, %v1032_v12 }
 0x219   :  { %2879 = vmatpush.bf16.msra.mxu2 %v3674_v35  ;;  %2866 = vmatpush.bf16.msra.mxu1 %v4630_v7  ;;  %v7516_v28 = vpop.f32.mrf.mxu1  ;;  %v5246_v7 = vld [vmem:[%s7729_s7 + $0x644] sm:$0xf]  ;;  %v5353_v58 = vld [vmem:[%s7732_s9 + $0x98] sm:$0xff] }
 0x21a   :  { %2901 = vmatpush.bf16.msrb.mxu0 %v4154_v38  ;;  %v5198_v38 = vld [vmem:[%s7729_s7 + $0x4c4] sm:$0xf] }
 0x21b   :  { %2942 = vmatpush.bf16.msrb.mxu3 %v4682_v21  ;;  %v4487_v21 = vld [vmem:[%s7729_s7 + $0x688] sm:$0xf0] }
 0x21c   :  { %2880 = vmatmul.bf16.vlgmr.msra.gmra.mxu2 %v6155_v5  ;;  %2867 = vmatmul.bf16.vlgmr.msra.gmra.mxu1 %v6329_v49  ;;  %v4106_v5 = vor.u32 %v5156_v62, %v4103_v2  ;;  %v4490_v35 = vor.u32 %v5252_v30, %v4487_v21  ;;  %v5357_v62 = vld [vmem:[%s7732_s9 + $0xb8] sm:$0xff] }
 0x21d   :  { %2924 = vmatpush.bf16.msrb.mxu2 %v4610_v10  ;;  %2911 = vmatpush.bf16.msrb.mxu1 %v4418_v51  ;;  %v4463_v10 = vld [vmem:[%s7729_s7 + $0x658] sm:$0xf0] }
 0x21e   :  { %2902 = vmatpush.bf16.msrb.mxu0 %v4130_v60  ;;  %v4271_v51 = vld [vmem:[%s7729_s7 + $0x4d8] sm:$0xf0]  ;;  %v4466_v40 = vor.u32 %v5246_v7, %v4463_v10  ;;  %v5342_v10 = vld [vmem:[%s7732_s9 + $0x40] sm:$0xff] }
 0x21f   :  { %2943 = vmatpush.bf16.msrb.mxu3 %v4658_v44  ;;  %v7533_v36 = vpop.f32.mrf.mxu2  ;;  %v4274_v42 = vor.u32 %v5198_v38, %v4271_v51  ;;  %v5240_v44 = vld [vmem:[%s7729_s7 + $0x614] sm:$0xf] }
 0x220   :  { %v4442_v57 = vor.u32 %v5240_v44, %v4439_v45 }
 0x221   :  { %2925 = vmatpush.bf16.msrb.mxu2 %v4586_v59  ;;  %2912 = vmatpush.bf16.msrb.mxu1 %v4394_v61  ;;  %v2662_v39 = vpop.f32.mrf.mxu1  ;;  %v4250_v61 = vor.u32 %v5192_v53, %v4247_v54 }
 0x222   :  { %2903 = vmatpush.bf16.msrb.mxu0 %v4106_v5 }
 0x223   :  { %2944 = vmatpush.bf16.msrb.mxu3 %v4634_v1  ;;  %v5349_v1 = vld [vmem:[%s7732_s9 + $0x78] sm:$0xff] }
 0x225   :  { %2926 = vmatpush.bf16.msrb.mxu2 %v4562_v22  ;;  %2913 = vmatpush.bf16.msrb.mxu1 %v4370_v9  ;;  %v5348_v22 = vld [vmem:[%s7732_s9 + $0x70] sm:$0xff]  ;;  %v5355_v9 = vld [vmem:[%s7732_s9 + $0xa8] sm:$0xff] }
 0x226   :  { %2945 = vmatmul.bf16.vlgmr.msrb.gmra.mxu3 %v6329_v49  ;;  %2904 = vmatpush.bf16.msrb.mxu0 %v4082_v19  ;;  %v4322_v49 = vor.u32 %v5210_v26, %v4319_v27  ;;  %v5360_v19 = vld [vmem:[%s7732_s9 + $0xd0] sm:$0xff]  ;;  %v2950_v26 = vmax.f32 %v7236_v41, 0.0 }
 0x227   :  { %3389 = vmatpush.bf16.msra.mxu3 %v5365_v48  ;;  %v2675_v60 = vpop.f32.mrf.mxu2  ;;  %v5352_v27 = vld [vmem:[%s7732_s9 + $0x90] sm:$0xff]  ;;  %v5373_v48 = vld [vmem:[%s7732_s9 + $0x138] sm:$0xff] }
 0x228   :  { %v2956_v41 = vpack.c.bf16 %v2950_v26, %v2950_v26  ;;  %v5372_v60 = vld [vmem:[%s7732_s9 + $0x130] sm:$0xff] }
 0x229   :  { %2927 = vmatpush.bf16.msrb.mxu2 %v4538_v18  ;;  %2914 = vmatpush.bf16.msrb.mxu1 %v4346_v46  ;;  %v7569_v59 = vpop.f32.mrf.mxu3  ;;  %v5346_v18 = vld [vmem:[%s7732_s9 + $0x60] sm:$0xff]  ;;  %v2661_v46 = vadd.f32 %v7516_v28, %v2648_v16  ;;  %v5359_v28 = vld [vmem:[%s7732_s9 + $0xc8] sm:$0xff] }
 0x22a   :  { %2905 = vmatpush.bf16.msrb.mxu0 %v4058_v29 }
 0x22b   :  { %3390 = vmatpush.bf16.msra.mxu3 %v5364_v63  ;;  %v2674_v23 = vadd.f32 %v7533_v36, %v2661_v46  ;;  %v5371_v63 = vld [vmem:[%s7732_s9 + $0x128] sm:$0xff] }
 0x22c   :  { %v2699_v2 = vpop.f32.mrf.mxu0 }
 0x22d   :  { %2928 = vmatpush.bf16.msrb.mxu2 %v4514_v8  ;;  %2915 = vmatpush.bf16.msrb.mxu1 %v4322_v49  ;;  %v2687_v8 = vadd.f32 %v7431_v43, %v2674_v23  ;;  %v5344_v49 = vld [vmem:[%s7732_s9 + $0x50] sm:$0xff]  ;;  %v5358_v43 = vld [vmem:[%s7732_s9 + $0xc0] sm:$0xff] }
 0x22e   :  { %3350 = vmatpush.bf16.msra.mxu0 %v5341_v31  ;;  %v5351_v31 = vld [vmem:[%s7732_s9 + $0x88] sm:$0xff] }
 0x22f   :  { %2906 = vmatmul.bf16.vlgmr.msrb.gmra.mxu0 %v6222_v47  ;;  %v5339_v47 = vld [vmem:[%s7732_s9 + $0x28] sm:$0xff]  ;;  %3391 = vmatpush.bf16.msra.mxu3 %v5363_v4  ;;  %v2700_v30 = vadd.f32 %v2699_v2, %v2687_v8 }
 0x231   :  { %2929 = vmatpush.bf16.msrb.mxu2 %v4490_v35  ;;  %2916 = vmatpush.bf16.msrb.mxu1 %v4298_v37  ;;  %v2740_v5 = vpop.f32.mrf.mxu3  ;;  %v5350_v35 = vld [vmem:[%s7732_s9 + $0x80] sm:$0xff] }
 0x232   :  { %3351 = vmatpush.bf16.msra.mxu0 %v5340_v52  ;;  %v2951_v52 = vmax.f32 %v7396_v24, 0.0  ;;  %v5368_v5 = vld [vmem:[%s7732_s9 + $0x110] sm:$0xff] }
 0x233   :  { %3392 = vmatpush.bf16.msra.mxu3 %v5362_v11  ;;  %v5367_v11 = vld [vmem:[%s7732_s9 + $0x108] sm:$0xff] }
 0x234   :  { %v2701_v13 = vpop.f32.mrf.mxu0  ;;  %v2957_v39 = vpack.c.bf16 %v2951_v52, %v2951_v52 }
 0x235   :  { %2930 = vmatpush.bf16.msrb.mxu2 %v4466_v40  ;;  %2917 = vmatpush.bf16.msrb.mxu1 %v4274_v42  ;;  %v1033_v40 = vperm.slane %v7047_v50, 3 }
 0x236   :  { %3352 = vmatpush.bf16.msra.mxu0 %v5339_v47 }
 0x237   :  { %3393 = vmatpush.bf16.msra.mxu3 %v5361_v15 }
 0x239   :  { %2931 = vmatpush.bf16.msrb.mxu2 %v4442_v57  ;;  %2918 = vmatpush.bf16.msrb.mxu1 %v4250_v61  ;;  %v2712_v20 = vpop.f32.mrf.mxu1 }
 0x23a   :  { %3353 = vmatpush.bf16.msra.mxu0 %v5338_v0  ;;  %v2713_v32 = vadd.f32 %v2712_v20, %v2700_v30  ;;  %v5379_v20 = vld [vmem:[%s7732_s9 + $0x168] sm:$0xff] }
 0x23b   :  { %3394 = vmatpush.bf16.msra.mxu3 %v5360_v19 }
 0x23c   :  { %2932 = vmatmul.bf16.vlgmr.msrb.gmra.mxu2 %v6337_v56  ;;  %2919 = vmatmul.bf16.vlgmr.msrb.gmra.mxu1 %v6134_v55  ;;  %v5336_v56 = vld [vmem:[%s7732_s9 + $0x10] sm:$0xff]  ;;  %v5347_v55 = vld [vmem:[%s7732_s9 + $0x68] sm:$0xff]  ;;  %v2952_v36 = vmax.f32 %v2713_v32, 0.0 }
 0x23d   :  { %3376 = vmatpush.bf16.msra.mxu2 %v5357_v62  ;;  %3363 = vmatpush.bf16.msra.mxu1 %v5349_v1 }
 0x23e   :  { %3354 = vmatpush.bf16.msra.mxu0 %v5337_v6  ;;  %v2958_v38 = vpack.c.bf16 %v2952_v36, %v2952_v36  ;;  %v5369_v6 = vld [vmem:[%s7732_s9 + $0x118] sm:$0xff] }
 0x23f   :  { %v2725_v29 = vpop.f32.mrf.mxu2  ;;  %3395 = vmatpush.bf16.msra.mxu3 %v5359_v28  ;;  %v5377_v28 = vld [vmem:[%s7732_s9 + $0x158] sm:$0xff] }
 0x240   :  { %v2726_v44 = vadd.f32 %v2725_v29, %v1033_v40  ;;  %v5376_v29 = vld [vmem:[%s7732_s9 + $0x150] sm:$0xff] }
 0x241   :  { %3377 = vmatpush.bf16.msra.mxu2 %v5356_v3  ;;  %3364 = vmatpush.bf16.msra.mxu1 %v5348_v22  ;;  %v2714_v21 = vpop.f32.mrf.mxu1  ;;  %v5370_v3 = vld [vmem:[%s7732_s9 + $0x120] sm:$0xff] }
 0x242   :  { %3355 = vmatpush.bf16.msra.mxu0 %v5336_v56  ;;  %v2739_v47 = vadd.f32 %v7569_v59, %v2726_v44  ;;  %v5366_v56 = vld [vmem:[%s7732_s9 + $0x100] sm:$0xff] }
 0x243   :  { %3396 = vmatpush.bf16.msra.mxu3 %v5358_v43 }
 0x245   :  { %3378 = vmatpush.bf16.msra.mxu2 %v5355_v9  ;;  %3365 = vmatpush.bf16.msra.mxu1 %v5347_v55 }
 0x246   :  { %3356 = vmatpush.bf16.msra.mxu0 %v5335_v17  ;;  %v5380_v17 = vld [vmem:[%s7732_s9 + $0x170] sm:$0xff] }
 0x247   :  { %v2727_v7 = vpop.f32.mrf.mxu2 }
 0x249   :  { %3379 = vmatpush.bf16.msra.mxu2 %v5354_v14  ;;  %3366 = vmatpush.bf16.msra.mxu1 %v5346_v18  ;;  %v2790_v37 = vpop.f32.mrf.mxu3  ;;  %v5381_v14 = vld [vmem:[%s7732_s9 + $0x178] sm:$0xff]  ;;  %v5384_v18 = vld [vmem:[%s7731_s8] sm:$0x3f] }
 0x24a   :  { %3357 = vmatpush.bf16.msra.mxu0 %v5334_v34  ;;  %v1034_v19 = vperm.slane %v5384_v18, 4 }
 0x24c   :  { %v2751_v51 = vpop.f32.mrf.mxu0 }
 0x24d   :  { %3380 = vmatpush.bf16.msra.mxu2 %v5353_v58  ;;  %3367 = vmatpush.bf16.msra.mxu1 %v5345_v25  ;;  %v2752_v24 = vadd.f32 %v2751_v51, %v2739_v47  ;;  %v5378_v25 = vld [vmem:[%s7732_s9 + $0x160] sm:$0xff] }
 0x24e   :  { %3358 = vmatmul.bf16.vlgmr.msra.gmra.mxu0 %v2956_v41 }
 0x24f   :  { %3402 = vmatpush.bf16.msrb.mxu0 %v5373_v48 }
 0x251   :  { %3381 = vmatpush.bf16.msra.mxu2 %v5352_v27  ;;  %3368 = vmatpush.bf16.msra.mxu1 %v5344_v49  ;;  %v2792_v42 = vpop.f32.mrf.mxu3 }
 0x253   :  { %3403 = vmatpush.bf16.msrb.mxu0 %v5372_v60 }
 0x254   :  { %v2753_v45 = vpop.f32.mrf.mxu0 }
 0x255   :  { %3382 = vmatpush.bf16.msra.mxu2 %v5351_v31  ;;  %3369 = vmatpush.bf16.msra.mxu1 %v5343_v33  ;;  %v5375_v31 = vld [vmem:[%s7732_s9 + $0x148] sm:$0xff] }
 0x257   :  { %3404 = vmatpush.bf16.msrb.mxu0 %v5371_v63 }
 0x259   :  { %3383 = vmatpush.bf16.msra.mxu2 %v5350_v35  ;;  %3370 = vmatpush.bf16.msra.mxu1 %v5342_v10  ;;  %v2764_v53 = vpop.f32.mrf.mxu1  ;;  %v5374_v35 = vld [vmem:[%s7732_s9 + $0x140] sm:$0xff]  ;;  %v1035_v10 = vperm.slane %v5384_v18, 5 }
 0x25a   :  { %v2765_v54 = vadd.f32 %v2764_v53, %v2752_v24 }
 0x25b   :  { %3405 = vmatpush.bf16.msrb.mxu0 %v5370_v3 }
 0x25c   :  { %3384 = vmatmul.bf16.vlgmr.msra.gmra.mxu2 %v2958_v38  ;;  %3371 = vmatmul.bf16.vlgmr.msra.gmra.mxu1 %v2957_v39 }
 0x25d   :  { %3415 = vmatpush.bf16.msrb.mxu1 %v5381_v14 }
 0x25f   :  { %v2777_v57 = vpop.f32.mrf.mxu2  ;;  %3406 = vmatpush.bf16.msrb.mxu0 %v5369_v6 }
 0x260   :  { %v2778_v61 = vadd.f32 %v2777_v57, %v2765_v54 }
 0x261   :  { %v2766_v62 = vpop.f32.mrf.mxu1  ;;  %3416 = vmatpush.bf16.msrb.mxu1 %v5380_v17 }
 0x262   :  { %v2791_v50 = vadd.f32 %v2790_v37, %v2778_v61  ;;  %v5383_v61 = vld [vmem:[%s7733_s10] ss:$0 sm:$0xff] }
 0x263   :  { %3407 = vmatpush.bf16.msrb.mxu0 %v5368_v5 }
 0x264   :  { %v2953_v0 = vmax.f32 %v2791_v50, 0.0 }
 0x265   :  { %3417 = vmatpush.bf16.msrb.mxu1 %v5379_v20 }
 0x266   :  { %v2959_v59 = vpack.c.bf16 %v2953_v0, %v2953_v0 }
 0x267   :  { %v2779_v2 = vpop.f32.mrf.mxu2  ;;  %3408 = vmatpush.bf16.msrb.mxu0 %v5367_v11 }
 0x268   :  { %3397 = vmatmul.bf16.vlgmr.msra.gmra.mxu3 %v2959_v59 }
 0x269   :  { %v2842_v1 = vpop.f32.mrf.mxu3  ;;  %3418 = vmatpush.bf16.msrb.mxu1 %v5378_v25 }
 0x26b   :  { %3409 = vmatpush.bf16.msrb.mxu0 %v5366_v56 }
 0x26c   :  { %v2803_v4 = vpop.f32.mrf.mxu0 }
 0x26d   :  { %v2804_v58 = vadd.f32 %v2803_v4, %v1034_v19  ;;  %3419 = vmatpush.bf16.msrb.mxu1 %v5377_v28 }
 0x271   :  { %v2844_v22 = vpop.f32.mrf.mxu3  ;;  %3420 = vmatpush.bf16.msrb.mxu1 %v5376_v29 }
 0x274   :  { %v2805_v9 = vpop.f32.mrf.mxu0 }
 0x275   :  { %3421 = vmatpush.bf16.msrb.mxu1 %v5375_v31 }
 0x279   :  { %v2816_v12 = vpop.f32.mrf.mxu1  ;;  %3422 = vmatpush.bf16.msrb.mxu1 %v5374_v35 }
 0x27a   :  { %v2817_v23 = vadd.f32 %v2816_v12, %v2804_v58 }
 0x27f   :  { %v2829_v55 = vpop.f32.mrf.mxu2 }
 0x280   :  { %v2830_v26 = vadd.f32 %v2829_v55, %v2817_v23 }
 0x281   :  { %v2818_v13 = vpop.f32.mrf.mxu1 }
 0x282   :  { %v2843_v8 = vadd.f32 %v2842_v1, %v2830_v26 }
 0x287   :  { %v2831_v16 = vpop.f32.mrf.mxu2 }
 0x289   :  { %v2894_v15 = vpop.f32.mrf.mxu3 }
 0x28c   :  { %v2855_v46 = vpop.f32.mrf.mxu0 }
 0x28d   :  { %v2856_v49 = vadd.f32 %v2855_v46, %v2843_v8 }
 0x291   :  { %v2896_v34 = vpop.f32.mrf.mxu3 }
 0x294   :  { %v2857_v27 = vpop.f32.mrf.mxu0 }
 0x299   :  { %v2868_v41 = vpop.f32.mrf.mxu1 }
 0x29a   :  { %v2869_v30 = vadd.f32 %v2868_v41, %v2856_v49 }
 0x29c   :  { %v2954_v21 = vmax.f32 %v2869_v30, 0.0 }
 0x29e   :  { %v2960_v43 = vpack.c.bf16 %v2954_v21, %v2954_v21 }
 0x29f   :  { %v2881_v32 = vpop.f32.mrf.mxu2 }
 0x2a0   :  { %3410 = vmatmul.bf16.vlgmr.msrb.gmra.mxu0 %v2960_v43  ;;  %v2882_v38 = vadd.f32 %v2881_v32, %v1035_v10 }
 0x2a1   :  { %v2870_v33 = vpop.f32.mrf.mxu1 }
 0x2a2   :  { %v2895_v39 = vadd.f32 %v2894_v15, %v2882_v38 }
 0x2a7   :  { %v2883_v37 = vpop.f32.mrf.mxu2 }
 0x2a9   :  { %v2946_v36 = vpop.f32.mrf.mxu3 }
 0x2ac   :  { %v2907_v7 = vpop.f32.mrf.mxu0 }
 0x2ad   :  { %v2908_v42 = vadd.f32 %v2907_v7, %v2895_v39 }
 0x2b1   :  { %v2948_v52 = vpop.f32.mrf.mxu3 }
 0x2b4   :  { %v2909_v51 = vpop.f32.mrf.mxu0 }
 0x2b9   :  { %v2920_v40 = vpop.f32.mrf.mxu1 }
 0x2ba   :  { %v2921_v44 = vadd.f32 %v2920_v40, %v2908_v42 }
 0x2bf   :  { %v2933_v45 = vpop.f32.mrf.mxu2 }
 0x2c0   :  { %v2934_v48 = vadd.f32 %v2933_v45, %v2921_v44 }
 0x2c1   :  { %v2922_v53 = vpop.f32.mrf.mxu1 }
 0x2c2   :  { %v2947_v47 = vadd.f32 %v2946_v36, %v2934_v48 }
 0x2c4   :  { %v2955_v24 = vmax.f32 %v2947_v47, 0.0 }
 0x2c6   :  { %v2961_v54 = vpack.c.bf16 %v2955_v24, %v2955_v24 }
 0x2c7   :  { %v2935_v57 = vpop.f32.mrf.mxu2 }
 0x2c8   :  { %3423 = vmatmul.bf16.vlgmr.msrb.gmra.mxu1 %v2961_v54 }
 0x2cb   :  { %v3359_v60 = vpop.f32.mrf.mxu0 }
 0x2cc   :  { %v3360_v62 = vadd.f32 %v5383_v61, %v3359_v60 }
 0x2d3   :  { %v3361_v50 = vpop.f32.mrf.mxu0 }
 0x2d9   :  { %v3372_v63 = vpop.f32.mrf.mxu1 }
 0x2da   :  { %v3373_v0 = vadd.f32 %v3372_v63, %v3360_v62 }
 0x2df   :  { %v3385_v59 = vpop.f32.mrf.mxu2 }
 0x2e0   :  { %v3386_v1 = vadd.f32 %v3385_v59, %v3373_v0 }
 0x2e1   :  { %v3374_v2 = vpop.f32.mrf.mxu1 }
 0x2e7   :  { %v3387_v3 = vpop.f32.mrf.mxu2 }
 0x2eb   :  { %v3398_v4 = vpop.f32.mrf.mxu3 }
 0x2ec   :  { %v3399_v6 = vadd.f32 %v3398_v4, %v3386_v1 }
 0x2f3   :  { %v3400_v22 = vpop.f32.mrf.mxu3 }
 0x31d   :  { %v3411_v5 = vpop.f32.mrf.mxu0 }
 0x31e   :  { %v3412_v11 = vadd.f32 %v3411_v5, %v3399_v6 }
 0x325   :  { %v3413_v9 = vpop.f32.mrf.mxu0 }
 0x345   :  { %v3424_v12 = vpop.f32.mrf.mxu1 }
 0x346   :  { %v3425_v56 = vadd.f32 %v3424_v12, %v3412_v11 }
 0x348   :  { %3429 = vst.msk [vmem:[%s7734_s11] sm:$0x3] %vm3428_vm4, %v3425_v56 }
 0x34d   :  { %v3426_v55 = vpop.f32.mrf.mxu1 }

</bundles_post_ra>
